<compile_context>
chip_gen: v7x
topology: tpu7x:2x2x1
jax: 0.10.0
libtpu: 0.0.40
codegen_flags: <defaults>
</compile_context>

<pallas_src>
import functools

import jax
import jax.numpy as jnp
from jax import lax
from jax.experimental import pallas as pl
from jax.experimental.pallas import tpu as pltpu


def _decoder_kernel(H, O, B,
                    # ---- inputs ----
                    dec_in_ref, enc_ref, h0_ref, c0_ref,
                    wx_ref, we_ref, wo_ref, wc_ref, wd_ref, whh_ref,
                    bq_ref, bkv_ref, bo_ref, blstm_ref, bhead_ref,
                    # ---- outputs ----
                    final_ref, hn_ref, cn_ref,
                    # ---- scratch ----
                    dec_out_ref):
    f32 = jnp.float32
    x = dec_in_ref[...]          # (B, H)  queries (seq-first "L" axis == batch)
    e = enc_ref[...]             # (B, H)  keys/values = encoder_outputs[:, 0, :]

    # ---------- fused x-side projection: [Wq | Wih_dec] ----------
    xw_all = jnp.dot(x, wx_ref[...], preferred_element_type=f32)          # (B, 5H)
    q = (xw_all[:, 0:H] + bq_ref[...]) * (1.0 / (float(H) ** 0.5))
    xw_x = xw_all[:, H:5 * H]                                             # (B, 4H)

    # ---------- nn.MultiheadAttention (num_heads=1, eval) ----------
    kv = jnp.dot(e, we_ref[...], preferred_element_type=f32) + bkv_ref[...]  # (B, 2H)
    k = kv[:, 0:H]
    v = kv[:, H:2 * H]
    scores = lax.dot_general(q, k, (((1,), (1,)), ((), ())),
                             preferred_element_type=f32)                  # (B, B)
    scores = scores - jnp.max(scores, axis=-1, keepdims=True)
    p = jnp.exp(scores)
    attn = p * pl.reciprocal(jnp.sum(p, axis=-1, keepdims=True), approx=True)
    ctx = jnp.dot(jnp.dot(attn, v, preferred_element_type=f32),
                  wo_ref[...], preferred_element_type=f32) + bo_ref[...]  # (B, H)

    # ---------- fused ctx-side projection: [Wih_ctx | Wgen_ctx | Wps_ctx] ----------
    cw_all = jnp.dot(ctx, wc_ref[...], preferred_element_type=f32)        # (B, 4H+O+1)
    xw = xw_x + cw_all[:, 0:4 * H] + blstm_ref[...]                       # (B, 4H) input-side gates
    gen_ctx = cw_all[:, 4 * H:4 * H + O]                                  # (B, O)
    ps_ctx = cw_all[:, 4 * H + O:4 * H + O + 1]                           # (B, 1)

    # ---------- nn.LSTM: 2-D input -> unbatched sequence of length B ----------
    # h/c live in vregs across the fully-unrolled recurrence; only dec_out rows
    # are written back per step (off the h/c critical path).
    whh = whh_ref[...]                                                    # (H, 4H)
    h = h0_ref[...]                                                       # (1, H)
    c = c0_ref[...]                                                       # (1, H)
    for t in range(B):                                                    # static unroll (B compile-time)
        g = xw[t:t + 1, :] + jnp.dot(h, whh, preferred_element_type=f32)  # (1, 4H)
        sg = jax.nn.sigmoid(g)     # full-width EUP ops, then slice per gate
        tg = jnp.tanh(g)           # PyTorch gate order: i, f, g, o
        i_g = sg[:, 0:H]
        f_g = sg[:, H:2 * H]
        g_g = tg[:, 2 * H:3 * H]
        o_g = sg[:, 3 * H:4 * H]
        c = f_g * c + i_g * g_g
        h = o_g * jnp.tanh(c)
        dec_out_ref[pl.ds(t, 1), :] = h
    hn_ref[...] = h
    cn_ref[...] = c

    # ---------- output head: combined = [decoder_output, context] ----------
    dec_out = dec_out_ref[...]                                            # (B, H)
    dw = (jnp.dot(dec_out, wd_ref[...], preferred_element_type=f32)
          + bhead_ref[...])                                               # (B, O+1)
    ps = jax.nn.sigmoid(dw[:, O:O + 1] + ps_ctx)                          # (B, 1)
    gen = dw[:, 0:O] + gen_ctx                                            # (B, O)
    gen = gen - jnp.max(gen, axis=-1, keepdims=True)
    log_sm = gen - jnp.log(jnp.sum(jnp.exp(gen), axis=-1, keepdims=True))
    ctx_sh = ctx - jnp.max(ctx, axis=-1, keepdims=True)
    ctx_e = jnp.exp(ctx_sh)
    pd = ctx_e * pl.reciprocal(jnp.sum(ctx_e, axis=-1, keepdims=True), approx=True)
    final_ref[...] = ps * pd + (1.0 - ps) * log_sm


def hierarchical_attention_decoder(params, decoder_input, encoder_outputs, decoder_hidden):
    """Pallas implementation of HierarchicalAttentionDecoder.forward (eval mode)."""
    f32 = jnp.float32
    B, S, H = encoder_outputs.shape
    assert S == 1, "PyTorch seq-first MHA only runs for seq_len == 1 (see layout note)"
    O = params["gen_weight"].shape[0]
    assert O == H, "LSTM input size (H+O) must equal concat width 2H -> output_size == hidden_size"
    assert decoder_input.shape == (B, H)
    h0, c0 = decoder_hidden                     # each (num_layers=1, H)

    enc = encoder_outputs[:, 0, :].astype(f32)  # keys/values over the batch axis

    # --- parameter plumbing (plain JAX glue): split packed / concat weights, transpose, fuse ---
    wq, wk, wv = jnp.split(params["in_proj_weight"], 3, axis=0)
    bq, bk, bv = jnp.split(params["in_proj_bias"], 3, axis=0)
    wih = params["weight_ih"]                   # (4H, H + O): cols [0:H]=dec_in, [H:2H]=context
    wih_d, wih_c = wih[:, :H].T, wih[:, H:].T   # (H, 4H) each
    whh_t = params["weight_hh"].T               # (H, 4H)
    b_lstm = (params["bias_ih"] + params["bias_hh"]).reshape(1, 4 * H)
    wgen = params["gen_weight"]                 # (O, 2H)
    wgen_d, wgen_c = wgen[:, :H].T, wgen[:, H:].T
    wps = params["ps_weight"]                   # (1, 2H)
    wps_d, wps_c = wps[:, :H].T, wps[:, H:].T

    # fused shared-LHS weight slabs
    W_x = jnp.concatenate([wq.T, wih_d], axis=1)              # (H, 5H)
    W_e = jnp.concatenate([wk.T, wv.T], axis=1)               # (H, 2H)
    W_c = jnp.concatenate([wih_c, wgen_c, wps_c], axis=1)     # (H, 4H+O+1)
    W_d = jnp.concatenate([wgen_d, wps_d], axis=1)            # (H, O+1)
    b_kv = jnp.concatenate([bk, bv]).reshape(1, 2 * H)
    b_head = jnp.concatenate([params["gen_bias"], params["ps_bias"]]).reshape(1, O + 1)

    args = (decoder_input.astype(f32), enc, h0.astype(f32), c0.astype(f32),
            W_x, W_e, params["out_proj_weight"].T, W_c, W_d, whh_t,
            bq.reshape(1, H), b_kv, params["out_proj_bias"].reshape(1, H),
            b_lstm, b_head)

    vmem = lambda: pl.BlockSpec(memory_space=pltpu.MemorySpace.VMEM)
    out_shape = (jax.ShapeDtypeStruct((B, O), f32),   # final_distribution
                 jax.ShapeDtypeStruct((1, H), f32),   # h_n
                 jax.ShapeDtypeStruct((1, H), f32))   # c_n

    final, h_n, c_n = pl.pallas_call(
        functools.partial(_decoder_kernel, H, O, B),
        out_shape=out_shape,
        in_specs=[vmem() for _ in args],
        out_specs=tuple(vmem() for _ in out_shape),
        scratch_shapes=[pltpu.VMEM((B, H), f32)],      # decoder_output sequence
    )(*args)
    return final, (h_n, c_n)


# ------------------------- deterministic parameter init -------------------------
def init_params(hidden_size, output_size, key):
    H, O = hidden_size, output_size
    ks = jax.random.split(key, 12)

    def u(k, shape, fan_in):
        bound = 1.0 / (float(fan_in) ** 0.5)
        return jax.random.uniform(k, shape, jnp.float32, -bound, bound)

    return dict(
        in_proj_weight=u(ks[0], (3 * H, H), H),
        in_proj_bias=u(ks[1], (3 * H,), H),
        out_proj_weight=u(ks[2], (H, H), H),
        out_proj_bias=u(ks[3], (H,), H),
        weight_ih=u(ks[4], (4 * H, H + O), H),
        weight_hh=u(ks[5], (4 * H, H), H),
        bias_ih=u(ks[6], (4 * H,), H),
        bias_hh=u(ks[7], (4 * H,), H),
        gen_weight=u(ks[8], (O, 2 * H), 2 * H),
        gen_bias=u(ks[9], (O,), 2 * H),
        ps_weight=u(ks[10], (1, 2 * H), 2 * H),
        ps_bias=u(ks[11], (1,), 2 * H),
    )


# ------------------------------ pure-JAX reference ------------------------------
def reference(params, decoder_input, encoder_outputs, decoder_hidden):
    B, S, H = encoder_outputs.shape
    enc = encoder_outputs[:, 0, :]
    wq, wk, wv = jnp.split(params["in_proj_weight"], 3, axis=0)
    bq, bk, bv = jnp.split(params["in_proj_bias"], 3, axis=0)
    q = decoder_input @ wq.T + bq
    k = enc @ wk.T + bk
    v = enc @ wv.T + bv
    attn = jax.nn.softmax((q / jnp.sqrt(float(H))) @ k.T, axis=-1)
    ctx = (attn @ v) @ params["out_proj_weight"].T + params["out_proj_bias"]
    x_seq = jnp.concatenate([decoder_input, ctx], axis=-1)         # (B, 2H)
    h, c = decoder_hidden
    wih, whh = params["weight_ih"], params["weight_hh"]
    b = params["bias_ih"] + params["bias_hh"]
    outs = []
    for t in range(B):
        g = x_seq[t:t + 1] @ wih.T + h @ whh.T + b
        i_g = jax.nn.sigmoid(g[:, :H]); f_g = jax.nn.sigmoid(g[:, H:2 * H])
        g_g = jnp.tanh(g[:, 2 * H:3 * H]); o_g = jax.nn.sigmoid(g[:, 3 * H:])
        c = f_g * c + i_g * g_g
        h = o_g * jnp.tanh(c)
        outs.append(h)
    dec_out = jnp.concatenate(outs, axis=0)
    combined = jnp.concatenate([dec_out, ctx], axis=-1)
    ps = jax.nn.sigmoid(combined @ params["ps_weight"].T + params["ps_bias"])
    gen = jax.nn.log_softmax(combined @ params["gen_weight"].T + params["gen_bias"], axis=-1)
    pd = jax.nn.softmax(ctx, axis=-1)
    final = ps * pd + (1 - ps) * gen
    return final, (h, c)


if __name__ == "__main__":
    B, S, H = 16, 1, 32       # seq_len must be 1 (PyTorch seq-first MHA constraint)
    O = H                     # output_size must equal hidden_size (LSTM input width)

    key = jax.random.PRNGKey(0)
    kp, k1, k2, k3, k4 = jax.random.split(key, 5)
    params = init_params(H, O, kp)
    decoder_input = jax.random.normal(k1, (B, H), jnp.float32)
    encoder_outputs = jax.random.normal(k2, (B, S, H), jnp.float32)
    h0 = jax.random.normal(k3, (1, H), jnp.float32)
    c0 = jax.random.normal(k4, (1, H), jnp.float32)

    final, (h_n, c_n) = hierarchical_attention_decoder(
        params, decoder_input, encoder_outputs, (h0, c0))
    jax.block_until_ready((final, h_n, c_n))

    ref_final, (ref_h, ref_c) = reference(params, decoder_input, encoder_outputs, (h0, c0))
    assert jnp.allclose(final, ref_final, atol=2e-2, rtol=2e-2)
    assert jnp.allclose(h_n, ref_h, atol=2e-2, rtol=2e-2)
    assert jnp.allclose(c_n, ref_c, atol=2e-2, rtol=2e-2)

    # NOTE: final = ps*softmax(ctx) + (1-ps)*log_softmax(...) mixes a probability
    # with a log-probability; reproduced faithfully from the PyTorch module.
    print("KERNEL_OK")
</pallas_src>

<mosaic_0001>
module attributes {stable_mosaic.version = 11 : i64} {
  func.func @_decoder_kernel(%arg0: memref<16x32xf32, #tpu.memory_space<vmem>>, %arg1: memref<16x32xf32, #tpu.memory_space<vmem>>, %arg2: memref<1x32xf32, #tpu.memory_space<vmem>>, %arg3: memref<1x32xf32, #tpu.memory_space<vmem>>, %arg4: memref<32x160xf32, #tpu.memory_space<vmem>>, %arg5: memref<32x64xf32, #tpu.memory_space<vmem>>, %arg6: memref<32x32xf32, #tpu.memory_space<vmem>>, %arg7: memref<32x161xf32, #tpu.memory_space<vmem>>, %arg8: memref<32x33xf32, #tpu.memory_space<vmem>>, %arg9: memref<32x128xf32, #tpu.memory_space<vmem>>, %arg10: memref<1x32xf32, #tpu.memory_space<vmem>>, %arg11: memref<1x64xf32, #tpu.memory_space<vmem>>, %arg12: memref<1x32xf32, #tpu.memory_space<vmem>>, %arg13: memref<1x128xf32, #tpu.memory_space<vmem>>, %arg14: memref<1x33xf32, #tpu.memory_space<vmem>>, %arg15: memref<16x32xf32, #tpu.memory_space<vmem>>, %arg16: memref<1x32xf32, #tpu.memory_space<vmem>>, %arg17: memref<1x32xf32, #tpu.memory_space<vmem>>, %arg18: memref<16x32xf32, #tpu.memory_space<vmem>>) attributes {dimension_semantics = [], scalar_prefetch = 0 : i64, scratch_operands = 1 : i64, tpu.core_type = #tpu.core_type<tc>} {
    %c0 = arith.constant 0 : index
    %c0_0 = arith.constant 0 : index
    %0 = vector.load %arg0[%c0, %c0_0] : memref<16x32xf32, #tpu.memory_space<vmem>>, vector<16x32xf32>
    %c0_1 = arith.constant 0 : index
    %c0_2 = arith.constant 0 : index
    %1 = vector.load %arg1[%c0_1, %c0_2] : memref<16x32xf32, #tpu.memory_space<vmem>>, vector<16x32xf32>
    %c0_3 = arith.constant 0 : index
    %c0_4 = arith.constant 0 : index
    %2 = vector.load %arg4[%c0_3, %c0_4] : memref<32x160xf32, #tpu.memory_space<vmem>>, vector<32x160xf32>
    %cst = arith.constant dense<0.000000e+00> : vector<16x160xf32>
    %3 = tpu.matmul %0, %2, %cst {dimension_numbers = #tpu.dot_dimension_numbers<[1], [0], [0], [1], [0, 0, 1, 1], [], []>} : vector<16x32xf32>, vector<32x160xf32>, vector<16x160xf32> -> vector<16x160xf32>
    %4 = vector.extract_strided_slice %3 {offsets = [0, 0], sizes = [16, 32], strides = [1, 1]} : vector<16x160xf32> to vector<16x32xf32>
    %c0_5 = arith.constant 0 : index
    %c0_6 = arith.constant 0 : index
    %5 = vector.load %arg10[%c0_5, %c0_6] : memref<1x32xf32, #tpu.memory_space<vmem>>, vector<1x32xf32>
    %6 = vector.broadcast %5 : vector<1x32xf32> to vector<16x32xf32>
    %7 = arith.addf %4, %6 : vector<16x32xf32>
    %cst_7 = arith.constant 0.176776692 : f32
    %8 = vector.broadcast %cst_7 : f32 to vector<16x32xf32>
    %9 = arith.mulf %7, %8 : vector<16x32xf32>
    %10 = vector.extract_strided_slice %3 {offsets = [0, 32], sizes = [16, 128], strides = [1, 1]} : vector<16x160xf32> to vector<16x128xf32>
    %c0_8 = arith.constant 0 : index
    %c0_9 = arith.constant 0 : index
    %11 = vector.load %arg5[%c0_8, %c0_9] : memref<32x64xf32, #tpu.memory_space<vmem>>, vector<32x64xf32>
    %cst_10 = arith.constant dense<0.000000e+00> : vector<16x64xf32>
    %12 = tpu.matmul %1, %11, %cst_10 {dimension_numbers = #tpu.dot_dimension_numbers<[1], [0], [0], [1], [0, 0, 1, 1], [], []>} : vector<16x32xf32>, vector<32x64xf32>, vector<16x64xf32> -> vector<16x64xf32>
    %c0_11 = arith.constant 0 : index
    %c0_12 = arith.constant 0 : index
    %13 = vector.load %arg11[%c0_11, %c0_12] : memref<1x64xf32, #tpu.memory_space<vmem>>, vector<1x64xf32>
    %14 = vector.broadcast %13 : vector<1x64xf32> to vector<16x64xf32>
    %15 = arith.addf %12, %14 : vector<16x64xf32>
    %16 = vector.extract_strided_slice %15 {offsets = [0, 0], sizes = [16, 32], strides = [1, 1]} : vector<16x64xf32> to vector<16x32xf32>
    %17 = vector.extract_strided_slice %15 {offsets = [0, 32], sizes = [16, 32], strides = [1, 1]} : vector<16x64xf32> to vector<16x32xf32>
    %cst_13 = arith.constant dense<0.000000e+00> : vector<16x16xf32>
    %18 = tpu.matmul %9, %16, %cst_13 {dimension_numbers = #tpu.dot_dimension_numbers<[1], [1], [0], [0], [0, 0, 1, 0], [], []>} : vector<16x32xf32>, vector<16x32xf32>, vector<16x16xf32> -> vector<16x16xf32>
    %cst_14 = arith.constant dense<0xFF800000> : vector<16xf32>
    %19 = vector.multi_reduction <maximumf>, %18, %cst_14 [1] : vector<16x16xf32> to vector<16xf32>
    %20 = vector.shape_cast %19 : vector<16xf32> to vector<16x1xf32>
    %21 = vector.broadcast %20 : vector<16x1xf32> to vector<16x16xf32>
    %22 = arith.subf %18, %21 : vector<16x16xf32>
    %23 = math.exp %22 : vector<16x16xf32>
    %cst_15 = arith.constant dense<0.000000e+00> : vector<16xf32>
    %24 = vector.multi_reduction <add>, %23, %cst_15 [1] : vector<16x16xf32> to vector<16xf32>
    %25 = vector.shape_cast %24 : vector<16xf32> to vector<16x1xf32>
    %26 = tpu.reciprocal %25 {approx = true} : vector<16x1xf32> -> vector<16x1xf32>
    %27 = vector.broadcast %26 : vector<16x1xf32> to vector<16x16xf32>
    %28 = arith.mulf %23, %27 : vector<16x16xf32>
    %cst_16 = arith.constant dense<0.000000e+00> : vector<16x32xf32>
    %29 = tpu.matmul %28, %17, %cst_16 {dimension_numbers = #tpu.dot_dimension_numbers<[1], [0], [0], [1], [0, 0, 1, 1], [], []>} : vector<16x16xf32>, vector<16x32xf32>, vector<16x32xf32> -> vector<16x32xf32>
    %c0_17 = arith.constant 0 : index
    %c0_18 = arith.constant 0 : index
    %30 = vector.load %arg6[%c0_17, %c0_18] : memref<32x32xf32, #tpu.memory_space<vmem>>, vector<32x32xf32>
    %cst_19 = arith.constant dense<0.000000e+00> : vector<16x32xf32>
    %31 = tpu.matmul %29, %30, %cst_19 {dimension_numbers = #tpu.dot_dimension_numbers<[1], [0], [0], [1], [0, 0, 1, 1], [], []>} : vector<16x32xf32>, vector<32x32xf32>, vector<16x32xf32> -> vector<16x32xf32>
    %c0_20 = arith.constant 0 : index
    %c0_21 = arith.constant 0 : index
    %32 = vector.load %arg12[%c0_20, %c0_21] : memref<1x32xf32, #tpu.memory_space<vmem>>, vector<1x32xf32>
    %33 = vector.broadcast %32 : vector<1x32xf32> to vector<16x32xf32>
    %34 = arith.addf %31, %33 : vector<16x32xf32>
    %c0_22 = arith.constant 0 : index
    %c0_23 = arith.constant 0 : index
    %35 = vector.load %arg7[%c0_22, %c0_23] : memref<32x161xf32, #tpu.memory_space<vmem>>, vector<32x161xf32>
    %cst_24 = arith.constant dense<0.000000e+00> : vector<16x161xf32>
    %36 = tpu.matmul %34, %35, %cst_24 {dimension_numbers = #tpu.dot_dimension_numbers<[1], [0], [0], [1], [0, 0, 1, 1], [], []>} : vector<16x32xf32>, vector<32x161xf32>, vector<16x161xf32> -> vector<16x161xf32>
    %37 = vector.extract_strided_slice %36 {offsets = [0, 0], sizes = [16, 128], strides = [1, 1]} : vector<16x161xf32> to vector<16x128xf32>
    %38 = arith.addf %10, %37 : vector<16x128xf32>
    %c0_25 = arith.constant 0 : index
    %c0_26 = arith.constant 0 : index
    %39 = vector.load %arg13[%c0_25, %c0_26] : memref<1x128xf32, #tpu.memory_space<vmem>>, vector<1x128xf32>
    %40 = vector.broadcast %39 : vector<1x128xf32> to vector<16x128xf32>
    %41 = arith.addf %38, %40 : vector<16x128xf32>
    %42 = vector.extract_strided_slice %36 {offsets = [0, 128], sizes = [16, 32], strides = [1, 1]} : vector<16x161xf32> to vector<16x32xf32>
    %43 = vector.extract_strided_slice %36 {offsets = [0, 160], sizes = [16, 1], strides = [1, 1]} : vector<16x161xf32> to vector<16x1xf32>
    %c0_27 = arith.constant 0 : index
    %c0_28 = arith.constant 0 : index
    %44 = vector.load %arg9[%c0_27, %c0_28] : memref<32x128xf32, #tpu.memory_space<vmem>>, vector<32x128xf32>
    %c0_29 = arith.constant 0 : index
    %c0_30 = arith.constant 0 : index
    %45 = vector.load %arg2[%c0_29, %c0_30] : memref<1x32xf32, #tpu.memory_space<vmem>>, vector<1x32xf32>
    %c0_31 = arith.constant 0 : index
    %c0_32 = arith.constant 0 : index
    %46 = vector.load %arg3[%c0_31, %c0_32] : memref<1x32xf32, #tpu.memory_space<vmem>>, vector<1x32xf32>
    %47 = vector.extract_strided_slice %41 {offsets = [0, 0], sizes = [1, 128], strides = [1, 1]} : vector<16x128xf32> to vector<1x128xf32>
    %cst_33 = arith.constant dense<0.000000e+00> : vector<1x128xf32>
    %48 = tpu.matmul %45, %44, %cst_33 {dimension_numbers = #tpu.dot_dimension_numbers<[1], [0], [0], [1], [0, 0, 1, 1], [], []>} : vector<1x32xf32>, vector<32x128xf32>, vector<1x128xf32> -> vector<1x128xf32>
    %49 = arith.addf %47, %48 : vector<1x128xf32>
    %50 = arith.negf %49 : vector<1x128xf32>
    %51 = math.exp %50 : vector<1x128xf32>
    %cst_34 = arith.constant 1.000000e+00 : f32
    %52 = vector.broadcast %cst_34 : f32 to vector<1x128xf32>
    %53 = arith.addf %52, %51 : vector<1x128xf32>
    %54 = arith.divf %52, %53 : vector<1x128xf32>
    %55 = math.tanh %49 : vector<1x128xf32>
    %56 = vector.extract_strided_slice %54 {offsets = [0, 0], sizes = [1, 32], strides = [1, 1]} : vector<1x128xf32> to vector<1x32xf32>
    %57 = vector.extract_strided_slice %54 {offsets = [0, 32], sizes = [1, 32], strides = [1, 1]} : vector<1x128xf32> to vector<1x32xf32>
    %58 = vector.extract_strided_slice %55 {offsets = [0, 64], sizes = [1, 32], strides = [1, 1]} : vector<1x128xf32> to vector<1x32xf32>
    %59 = vector.extract_strided_slice %54 {offsets = [0, 96], sizes = [1, 32], strides = [1, 1]} : vector<1x128xf32> to vector<1x32xf32>
    %60 = arith.mulf %57, %46 : vector<1x32xf32>
    %61 = arith.mulf %56, %58 : vector<1x32xf32>
    %62 = arith.addf %60, %61 : vector<1x32xf32>
    %63 = math.tanh %62 : vector<1x32xf32>
    %64 = arith.mulf %59, %63 : vector<1x32xf32>
    %c0_35 = arith.constant 0 : index
    %c0_36 = arith.constant 0 : index
    %65 = vector.load %arg18[%c0_35, %c0_36] : memref<16x32xf32, #tpu.memory_space<vmem>>, vector<1x32xf32>
    tpu.vector_store %arg18[%c0_35, %c0_36], %64 {strides = array<i32>} : memref<16x32xf32, #tpu.memory_space<vmem>>, vector<1x32xf32>,
    %66 = vector.extract_strided_slice %41 {offsets = [1, 0], sizes = [1, 128], strides = [1, 1]} : vector<16x128xf32> to vector<1x128xf32>
    %cst_37 = arith.constant dense<0.000000e+00> : vector<1x128xf32>
    %67 = tpu.matmul %64, %44, %cst_37 {dimension_numbers = #tpu.dot_dimension_numbers<[1], [0], [0], [1], [0, 0, 1, 1], [], []>} : vector<1x32xf32>, vector<32x128xf32>, vector<1x128xf32> -> vector<1x128xf32>
    %68 = arith.addf %66, %67 : vector<1x128xf32>
    %69 = arith.negf %68 : vector<1x128xf32>
    %70 = math.exp %69 : vector<1x128xf32>
    %cst_38 = arith.constant 1.000000e+00 : f32
    %71 = vector.broadcast %cst_38 : f32 to vector<1x128xf32>
    %72 = arith.addf %71, %70 : vector<1x128xf32>
    %73 = arith.divf %71, %72 : vector<1x128xf32>
    %74 = math.tanh %68 : vector<1x128xf32>
    %75 = vector.extract_strided_slice %73 {offsets = [0, 0], sizes = [1, 32], strides = [1, 1]} : vector<1x128xf32> to vector<1x32xf32>
    %76 = vector.extract_strided_slice %73 {offsets = [0, 32], sizes = [1, 32], strides = [1, 1]} : vector<1x128xf32> to vector<1x32xf32>
    %77 = vector.extract_strided_slice %74 {offsets = [0, 64], sizes = [1, 32], strides = [1, 1]} : vector<1x128xf32> to vector<1x32xf32>
    %78 = vector.extract_strided_slice %73 {offsets = [0, 96], sizes = [1, 32], strides = [1, 1]} : vector<1x128xf32> to vector<1x32xf32>
    %79 = arith.mulf %76, %62 : vector<1x32xf32>
    %80 = arith.mulf %75, %77 : vector<1x32xf32>
    %81 = arith.addf %79, %80 : vector<1x32xf32>
    %82 = math.tanh %81 : vector<1x32xf32>
    %83 = arith.mulf %78, %82 : vector<1x32xf32>
    %c1 = arith.constant 1 : index
    %c0_39 = arith.constant 0 : index
    %84 = vector.load %arg18[%c1, %c0_39] : memref<16x32xf32, #tpu.memory_space<vmem>>, vector<1x32xf32>
    tpu.vector_store %arg18[%c1, %c0_39], %83 {strides = array<i32>} : memref<16x32xf32, #tpu.memory_space<vmem>>, vector<1x32xf32>,
    %85 = vector.extract_strided_slice %41 {offsets = [2, 0], sizes = [1, 128], strides = [1, 1]} : vector<16x128xf32> to vector<1x128xf32>
    %cst_40 = arith.constant dense<0.000000e+00> : vector<1x128xf32>
    %86 = tpu.matmul %83, %44, %cst_40 {dimension_numbers = #tpu.dot_dimension_numbers<[1], [0], [0], [1], [0, 0, 1, 1], [], []>} : vector<1x32xf32>, vector<32x128xf32>, vector<1x128xf32> -> vector<1x128xf32>
    %87 = arith.addf %85, %86 : vector<1x128xf32>
    %88 = arith.negf %87 : vector<1x128xf32>
    %89 = math.exp %88 : vector<1x128xf32>
    %cst_41 = arith.constant 1.000000e+00 : f32
    %90 = vector.broadcast %cst_41 : f32 to vector<1x128xf32>
    %91 = arith.addf %90, %89 : vector<1x128xf32>
    %92 = arith.divf %90, %91 : vector<1x128xf32>
    %93 = math.tanh %87 : vector<1x128xf32>
    %94 = vector.extract_strided_slice %92 {offsets = [0, 0], sizes = [1, 32], strides = [1, 1]} : vector<1x128xf32> to vector<1x32xf32>
    %95 = vector.extract_strided_slice %92 {offsets = [0, 32], sizes = [1, 32], strides = [1, 1]} : vector<1x128xf32> to vector<1x32xf32>
    %96 = vector.extract_strided_slice %93 {offsets = [0, 64], sizes = [1, 32], strides = [1, 1]} : vector<1x128xf32> to vector<1x32xf32>
    %97 = vector.extract_strided_slice %92 {offsets = [0, 96], sizes = [1, 32], strides = [1, 1]} : vector<1x128xf32> to vector<1x32xf32>
    %98 = arith.mulf %95, %81 : vector<1x32xf32>
    %99 = arith.mulf %94, %96 : vector<1x32xf32>
    %100 = arith.addf %98, %99 : vector<1x32xf32>
    %101 = math.tanh %100 : vector<1x32xf32>
    %102 = arith.mulf %97, %101 : vector<1x32xf32>
    %c2 = arith.constant 2 : index
    %c0_42 = arith.constant 0 : index
    %103 = vector.load %arg18[%c2, %c0_42] : memref<16x32xf32, #tpu.memory_space<vmem>>, vector<1x32xf32>
    tpu.vector_store %arg18[%c2, %c0_42], %102 {strides = array<i32>} : memref<16x32xf32, #tpu.memory_space<vmem>>, vector<1x32xf32>,
    %104 = vector.extract_strided_slice %41 {offsets = [3, 0], sizes = [1, 128], strides = [1, 1]} : vector<16x128xf32> to vector<1x128xf32>
    %cst_43 = arith.constant dense<0.000000e+00> : vector<1x128xf32>
    %105 = tpu.matmul %102, %44, %cst_43 {dimension_numbers = #tpu.dot_dimension_numbers<[1], [0], [0], [1], [0, 0, 1, 1], [], []>} : vector<1x32xf32>, vector<32x128xf32>, vector<1x128xf32> -> vector<1x128xf32>
    %106 = arith.addf %104, %105 : vector<1x128xf32>
    %107 = arith.negf %106 : vector<1x128xf32>
    %108 = math.exp %107 : vector<1x128xf32>
    %cst_44 = arith.constant 1.000000e+00 : f32
    %109 = vector.broadcast %cst_44 : f32 to vector<1x128xf32>
    %110 = arith.addf %109, %108 : vector<1x128xf32>
    %111 = arith.divf %109, %110 : vector<1x128xf32>
    %112 = math.tanh %106 : vector<1x128xf32>
    %113 = vector.extract_strided_slice %111 {offsets = [0, 0], sizes = [1, 32], strides = [1, 1]} : vector<1x128xf32> to vector<1x32xf32>
    %114 = vector.extract_strided_slice %111 {offsets = [0, 32], sizes = [1, 32], strides = [1, 1]} : vector<1x128xf32> to vector<1x32xf32>
    %115 = vector.extract_strided_slice %112 {offsets = [0, 64], sizes = [1, 32], strides = [1, 1]} : vector<1x128xf32> to vector<1x32xf32>
    %116 = vector.extract_strided_slice %111 {offsets = [0, 96], sizes = [1, 32], strides = [1, 1]} : vector<1x128xf32> to vector<1x32xf32>
    %117 = arith.mulf %114, %100 : vector<1x32xf32>
    %118 = arith.mulf %113, %115 : vector<1x32xf32>
    %119 = arith.addf %117, %118 : vector<1x32xf32>
    %120 = math.tanh %119 : vector<1x32xf32>
    %121 = arith.mulf %116, %120 : vector<1x32xf32>
    %c3 = arith.constant 3 : index
    %c0_45 = arith.constant 0 : index
    %122 = vector.load %arg18[%c3, %c0_45] : memref<16x32xf32, #tpu.memory_space<vmem>>, vector<1x32xf32>
    tpu.vector_store %arg18[%c3, %c0_45], %121 {strides = array<i32>} : memref<16x32xf32, #tpu.memory_space<vmem>>, vector<1x32xf32>,
    %123 = vector.extract_strided_slice %41 {offsets = [4, 0], sizes = [1, 128], strides = [1, 1]} : vector<16x128xf32> to vector<1x128xf32>
    %cst_46 = arith.constant dense<0.000000e+00> : vector<1x128xf32>
    %124 = tpu.matmul %121, %44, %cst_46 {dimension_numbers = #tpu.dot_dimension_numbers<[1], [0], [0], [1], [0, 0, 1, 1], [], []>} : vector<1x32xf32>, vector<32x128xf32>, vector<1x128xf32> -> vector<1x128xf32>
    %125 = arith.addf %123, %124 : vector<1x128xf32>
    %126 = arith.negf %125 : vector<1x128xf32>
    %127 = math.exp %126 : vector<1x128xf32>
    %cst_47 = arith.constant 1.000000e+00 : f32
    %128 = vector.broadcast %cst_47 : f32 to vector<1x128xf32>
    %129 = arith.addf %128, %127 : vector<1x128xf32>
    %130 = arith.divf %128, %129 : vector<1x128xf32>
    %131 = math.tanh %125 : vector<1x128xf32>
    %132 = vector.extract_strided_slice %130 {offsets = [0, 0], sizes = [1, 32], strides = [1, 1]} : vector<1x128xf32> to vector<1x32xf32>
    %133 = vector.extract_strided_slice %130 {offsets = [0, 32], sizes = [1, 32], strides = [1, 1]} : vector<1x128xf32> to vector<1x32xf32>
    %134 = vector.extract_strided_slice %131 {offsets = [0, 64], sizes = [1, 32], strides = [1, 1]} : vector<1x128xf32> to vector<1x32xf32>
    %135 = vector.extract_strided_slice %130 {offsets = [0, 96], sizes = [1, 32], strides = [1, 1]} : vector<1x128xf32> to vector<1x32xf32>
    %136 = arith.mulf %133, %119 : vector<1x32xf32>
    %137 = arith.mulf %132, %134 : vector<1x32xf32>
    %138 = arith.addf %136, %137 : vector<1x32xf32>
    %139 = math.tanh %138 : vector<1x32xf32>
    %140 = arith.mulf %135, %139 : vector<1x32xf32>
    %c4 = arith.constant 4 : index
    %c0_48 = arith.constant 0 : index
    %141 = vector.load %arg18[%c4, %c0_48] : memref<16x32xf32, #tpu.memory_space<vmem>>, vector<1x32xf32>
    tpu.vector_store %arg18[%c4, %c0_48], %140 {strides = array<i32>} : memref<16x32xf32, #tpu.memory_space<vmem>>, vector<1x32xf32>,
    %142 = vector.extract_strided_slice %41 {offsets = [5, 0], sizes = [1, 128], strides = [1, 1]} : vector<16x128xf32> to vector<1x128xf32>
    %cst_49 = arith.constant dense<0.000000e+00> : vector<1x128xf32>
    %143 = tpu.matmul %140, %44, %cst_49 {dimension_numbers = #tpu.dot_dimension_numbers<[1], [0], [0], [1], [0, 0, 1, 1], [], []>} : vector<1x32xf32>, vector<32x128xf32>, vector<1x128xf32> -> vector<1x128xf32>
    %144 = arith.addf %142, %143 : vector<1x128xf32>
    %145 = arith.negf %144 : vector<1x128xf32>
    %146 = math.exp %145 : vector<1x128xf32>
    %cst_50 = arith.constant 1.000000e+00 : f32
    %147 = vector.broadcast %cst_50 : f32 to vector<1x128xf32>
    %148 = arith.addf %147, %146 : vector<1x128xf32>
    %149 = arith.divf %147, %148 : vector<1x128xf32>
    %150 = math.tanh %144 : vector<1x128xf32>
    %151 = vector.extract_strided_slice %149 {offsets = [0, 0], sizes = [1, 32], strides = [1, 1]} : vector<1x128xf32> to vector<1x32xf32>
    %152 = vector.extract_strided_slice %149 {offsets = [0, 32], sizes = [1, 32], strides = [1, 1]} : vector<1x128xf32> to vector<1x32xf32>
    %153 = vector.extract_strided_slice %150 {offsets = [0, 64], sizes = [1, 32], strides = [1, 1]} : vector<1x128xf32> to vector<1x32xf32>
    %154 = vector.extract_strided_slice %149 {offsets = [0, 96], sizes = [1, 32], strides = [1, 1]} : vector<1x128xf32> to vector<1x32xf32>
    %155 = arith.mulf %152, %138 : vector<1x32xf32>
    %156 = arith.mulf %151, %153 : vector<1x32xf32>
    %157 = arith.addf %155, %156 : vector<1x32xf32>
    %158 = math.tanh %157 : vector<1x32xf32>
    %159 = arith.mulf %154, %158 : vector<1x32xf32>
    %c5 = arith.constant 5 : index
    %c0_51 = arith.constant 0 : index
    %160 = vector.load %arg18[%c5, %c0_51] : memref<16x32xf32, #tpu.memory_space<vmem>>, vector<1x32xf32>
    tpu.vector_store %arg18[%c5, %c0_51], %159 {strides = array<i32>} : memref<16x32xf32, #tpu.memory_space<vmem>>, vector<1x32xf32>,
    %161 = vector.extract_strided_slice %41 {offsets = [6, 0], sizes = [1, 128], strides = [1, 1]} : vector<16x128xf32> to vector<1x128xf32>
    %cst_52 = arith.constant dense<0.000000e+00> : vector<1x128xf32>
    %162 = tpu.matmul %159, %44, %cst_52 {dimension_numbers = #tpu.dot_dimension_numbers<[1], [0], [0], [1], [0, 0, 1, 1], [], []>} : vector<1x32xf32>, vector<32x128xf32>, vector<1x128xf32> -> vector<1x128xf32>
    %163 = arith.addf %161, %162 : vector<1x128xf32>
    %164 = arith.negf %163 : vector<1x128xf32>
    %165 = math.exp %164 : vector<1x128xf32>
    %cst_53 = arith.constant 1.000000e+00 : f32
    %166 = vector.broadcast %cst_53 : f32 to vector<1x128xf32>
    %167 = arith.addf %166, %165 : vector<1x128xf32>
    %168 = arith.divf %166, %167 : vector<1x128xf32>
    %169 = math.tanh %163 : vector<1x128xf32>
    %170 = vector.extract_strided_slice %168 {offsets = [0, 0], sizes = [1, 32], strides = [1, 1]} : vector<1x128xf32> to vector<1x32xf32>
    %171 = vector.extract_strided_slice %168 {offsets = [0, 32], sizes = [1, 32], strides = [1, 1]} : vector<1x128xf32> to vector<1x32xf32>
    %172 = vector.extract_strided_slice %169 {offsets = [0, 64], sizes = [1, 32], strides = [1, 1]} : vector<1x128xf32> to vector<1x32xf32>
    %173 = vector.extract_strided_slice %168 {offsets = [0, 96], sizes = [1, 32], strides = [1, 1]} : vector<1x128xf32> to vector<1x32xf32>
    %174 = arith.mulf %171, %157 : vector<1x32xf32>
    %175 = arith.mulf %170, %172 : vector<1x32xf32>
    %176 = arith.addf %174, %175 : vector<1x32xf32>
    %177 = math.tanh %176 : vector<1x32xf32>
    %178 = arith.mulf %173, %177 : vector<1x32xf32>
    %c6 = arith.constant 6 : index
    %c0_54 = arith.constant 0 : index
    %179 = vector.load %arg18[%c6, %c0_54] : memref<16x32xf32, #tpu.memory_space<vmem>>, vector<1x32xf32>
    tpu.vector_store %arg18[%c6, %c0_54], %178 {strides = array<i32>} : memref<16x32xf32, #tpu.memory_space<vmem>>, vector<1x32xf32>,
    %180 = vector.extract_strided_slice %41 {offsets = [7, 0], sizes = [1, 128], strides = [1, 1]} : vector<16x128xf32> to vector<1x128xf32>
    %cst_55 = arith.constant dense<0.000000e+00> : vector<1x128xf32>
    %181 = tpu.matmul %178, %44, %cst_55 {dimension_numbers = #tpu.dot_dimension_numbers<[1], [0], [0], [1], [0, 0, 1, 1], [], []>} : vector<1x32xf32>, vector<32x128xf32>, vector<1x128xf32> -> vector<1x128xf32>
    %182 = arith.addf %180, %181 : vector<1x128xf32>
    %183 = arith.negf %182 : vector<1x128xf32>
    %184 = math.exp %183 : vector<1x128xf32>
    %cst_56 = arith.constant 1.000000e+00 : f32
    %185 = vector.broadcast %cst_56 : f32 to vector<1x128xf32>
    %186 = arith.addf %185, %184 : vector<1x128xf32>
    %187 = arith.divf %185, %186 : vector<1x128xf32>
    %188 = math.tanh %182 : vector<1x128xf32>
    %189 = vector.extract_strided_slice %187 {offsets = [0, 0], sizes = [1, 32], strides = [1, 1]} : vector<1x128xf32> to vector<1x32xf32>
    %190 = vector.extract_strided_slice %187 {offsets = [0, 32], sizes = [1, 32], strides = [1, 1]} : vector<1x128xf32> to vector<1x32xf32>
    %191 = vector.extract_strided_slice %188 {offsets = [0, 64], sizes = [1, 32], strides = [1, 1]} : vector<1x128xf32> to vector<1x32xf32>
    %192 = vector.extract_strided_slice %187 {offsets = [0, 96], sizes = [1, 32], strides = [1, 1]} : vector<1x128xf32> to vector<1x32xf32>
    %193 = arith.mulf %190, %176 : vector<1x32xf32>
    %194 = arith.mulf %189, %191 : vector<1x32xf32>
    %195 = arith.addf %193, %194 : vector<1x32xf32>
    %196 = math.tanh %195 : vector<1x32xf32>
    %197 = arith.mulf %192, %196 : vector<1x32xf32>
    %c7 = arith.constant 7 : index
    %c0_57 = arith.constant 0 : index
    %198 = vector.load %arg18[%c7, %c0_57] : memref<16x32xf32, #tpu.memory_space<vmem>>, vector<1x32xf32>
    tpu.vector_store %arg18[%c7, %c0_57], %197 {strides = array<i32>} : memref<16x32xf32, #tpu.memory_space<vmem>>, vector<1x32xf32>,
    %199 = vector.extract_strided_slice %41 {offsets = [8, 0], sizes = [1, 128], strides = [1, 1]} : vector<16x128xf32> to vector<1x128xf32>
    %cst_58 = arith.constant dense<0.000000e+00> : vector<1x128xf32>
    %200 = tpu.matmul %197, %44, %cst_58 {dimension_numbers = #tpu.dot_dimension_numbers<[1], [0], [0], [1], [0, 0, 1, 1], [], []>} : vector<1x32xf32>, vector<32x128xf32>, vector<1x128xf32> -> vector<1x128xf32>
    %201 = arith.addf %199, %200 : vector<1x128xf32>
    %202 = arith.negf %201 : vector<1x128xf32>
    %203 = math.exp %202 : vector<1x128xf32>
    %cst_59 = arith.constant 1.000000e+00 : f32
    %204 = vector.broadcast %cst_59 : f32 to vector<1x128xf32>
    %205 = arith.addf %204, %203 : vector<1x128xf32>
    %206 = arith.divf %204, %205 : vector<1x128xf32>
    %207 = math.tanh %201 : vector<1x128xf32>
    %208 = vector.extract_strided_slice %206 {offsets = [0, 0], sizes = [1, 32], strides = [1, 1]} : vector<1x128xf32> to vector<1x32xf32>
    %209 = vector.extract_strided_slice %206 {offsets = [0, 32], sizes = [1, 32], strides = [1, 1]} : vector<1x128xf32> to vector<1x32xf32>
    %210 = vector.extract_strided_slice %207 {offsets = [0, 64], sizes = [1, 32], strides = [1, 1]} : vector<1x128xf32> to vector<1x32xf32>
    %211 = vector.extract_strided_slice %206 {offsets = [0, 96], sizes = [1, 32], strides = [1, 1]} : vector<1x128xf32> to vector<1x32xf32>
    %212 = arith.mulf %209, %195 : vector<1x32xf32>
    %213 = arith.mulf %208, %210 : vector<1x32xf32>
    %214 = arith.addf %212, %213 : vector<1x32xf32>
    %215 = math.tanh %214 : vector<1x32xf32>
    %216 = arith.mulf %211, %215 : vector<1x32xf32>
    %c8 = arith.constant 8 : index
    %c0_60 = arith.constant 0 : index
    %217 = vector.load %arg18[%c8, %c0_60] : memref<16x32xf32, #tpu.memory_space<vmem>>, vector<1x32xf32>
    tpu.vector_store %arg18[%c8, %c0_60], %216 {strides = array<i32>} : memref<16x32xf32, #tpu.memory_space<vmem>>, vector<1x32xf32>,
    %218 = vector.extract_strided_slice %41 {offsets = [9, 0], sizes = [1, 128], strides = [1, 1]} : vector<16x128xf32> to vector<1x128xf32>
    %cst_61 = arith.constant dense<0.000000e+00> : vector<1x128xf32>
    %219 = tpu.matmul %216, %44, %cst_61 {dimension_numbers = #tpu.dot_dimension_numbers<[1], [0], [0], [1], [0, 0, 1, 1], [], []>} : vector<1x32xf32>, vector<32x128xf32>, vector<1x128xf32> -> vector<1x128xf32>
    %220 = arith.addf %218, %219 : vector<1x128xf32>
    %221 = arith.negf %220 : vector<1x128xf32>
    %222 = math.exp %221 : vector<1x128xf32>
    %cst_62 = arith.constant 1.000000e+00 : f32
    %223 = vector.broadcast %cst_62 : f32 to vector<1x128xf32>
    %224 = arith.addf %223, %222 : vector<1x128xf32>
    %225 = arith.divf %223, %224 : vector<1x128xf32>
    %226 = math.tanh %220 : vector<1x128xf32>
    %227 = vector.extract_strided_slice %225 {offsets = [0, 0], sizes = [1, 32], strides = [1, 1]} : vector<1x128xf32> to vector<1x32xf32>
    %228 = vector.extract_strided_slice %225 {offsets = [0, 32], sizes = [1, 32], strides = [1, 1]} : vector<1x128xf32> to vector<1x32xf32>
    %229 = vector.extract_strided_slice %226 {offsets = [0, 64], sizes = [1, 32], strides = [1, 1]} : vector<1x128xf32> to vector<1x32xf32>
    %230 = vector.extract_strided_slice %225 {offsets = [0, 96], sizes = [1, 32], strides = [1, 1]} : vector<1x128xf32> to vector<1x32xf32>
    %231 = arith.mulf %228, %214 : vector<1x32xf32>
    %232 = arith.mulf %227, %229 : vector<1x32xf32>
    %233 = arith.addf %231, %232 : vector<1x32xf32>
    %234 = math.tanh %233 : vector<1x32xf32>
    %235 = arith.mulf %230, %234 : vector<1x32xf32>
    %c9 = arith.constant 9 : index
    %c0_63 = arith.constant 0 : index
    %236 = vector.load %arg18[%c9, %c0_63] : memref<16x32xf32, #tpu.memory_space<vmem>>, vector<1x32xf32>
    tpu.vector_store %arg18[%c9, %c0_63], %235 {strides = array<i32>} : memref<16x32xf32, #tpu.memory_space<vmem>>, vector<1x32xf32>,
    %237 = vector.extract_strided_slice %41 {offsets = [10, 0], sizes = [1, 128], strides = [1, 1]} : vector<16x128xf32> to vector<1x128xf32>
    %cst_64 = arith.constant dense<0.000000e+00> : vector<1x128xf32>
    %238 = tpu.matmul %235, %44, %cst_64 {dimension_numbers = #tpu.dot_dimension_numbers<[1], [0], [0], [1], [0, 0, 1, 1], [], []>} : vector<1x32xf32>, vector<32x128xf32>, vector<1x128xf32> -> vector<1x128xf32>
    %239 = arith.addf %237, %238 : vector<1x128xf32>
    %240 = arith.negf %239 : vector<1x128xf32>
    %241 = math.exp %240 : vector<1x128xf32>
    %cst_65 = arith.constant 1.000000e+00 : f32
    %242 = vector.broadcast %cst_65 : f32 to vector<1x128xf32>
    %243 = arith.addf %242, %241 : vector<1x128xf32>
    %244 = arith.divf %242, %243 : vector<1x128xf32>
    %245 = math.tanh %239 : vector<1x128xf32>
    %246 = vector.extract_strided_slice %244 {offsets = [0, 0], sizes = [1, 32], strides = [1, 1]} : vector<1x128xf32> to vector<1x32xf32>
    %247 = vector.extract_strided_slice %244 {offsets = [0, 32], sizes = [1, 32], strides = [1, 1]} : vector<1x128xf32> to vector<1x32xf32>
    %248 = vector.extract_strided_slice %245 {offsets = [0, 64], sizes = [1, 32], strides = [1, 1]} : vector<1x128xf32> to vector<1x32xf32>
    %249 = vector.extract_strided_slice %244 {offsets = [0, 96], sizes = [1, 32], strides = [1, 1]} : vector<1x128xf32> to vector<1x32xf32>
    %250 = arith.mulf %247, %233 : vector<1x32xf32>
    %251 = arith.mulf %246, %248 : vector<1x32xf32>
    %252 = arith.addf %250, %251 : vector<1x32xf32>
    %253 = math.tanh %252 : vector<1x32xf32>
    %254 = arith.mulf %249, %253 : vector<1x32xf32>
    %c10 = arith.constant 10 : index
    %c0_66 = arith.constant 0 : index
    %255 = vector.load %arg18[%c10, %c0_66] : memref<16x32xf32, #tpu.memory_space<vmem>>, vector<1x32xf32>
    tpu.vector_store %arg18[%c10, %c0_66], %254 {strides = array<i32>} : memref<16x32xf32, #tpu.memory_space<vmem>>, vector<1x32xf32>,
    %256 = vector.extract_strided_slice %41 {offsets = [11, 0], sizes = [1, 128], strides = [1, 1]} : vector<16x128xf32> to vector<1x128xf32>
    %cst_67 = arith.constant dense<0.000000e+00> : vector<1x128xf32>
    %257 = tpu.matmul %254, %44, %cst_67 {dimension_numbers = #tpu.dot_dimension_numbers<[1], [0], [0], [1], [0, 0, 1, 1], [], []>} : vector<1x32xf32>, vector<32x128xf32>, vector<1x128xf32> -> vector<1x128xf32>
    %258 = arith.addf %256, %257 : vector<1x128xf32>
    %259 = arith.negf %258 : vector<1x128xf32>
    %260 = math.exp %259 : vector<1x128xf32>
    %cst_68 = arith.constant 1.000000e+00 : f32
    %261 = vector.broadcast %cst_68 : f32 to vector<1x128xf32>
    %262 = arith.addf %261, %260 : vector<1x128xf32>
    %263 = arith.divf %261, %262 : vector<1x128xf32>
    %264 = math.tanh %258 : vector<1x128xf32>
    %265 = vector.extract_strided_slice %263 {offsets = [0, 0], sizes = [1, 32], strides = [1, 1]} : vector<1x128xf32> to vector<1x32xf32>
    %266 = vector.extract_strided_slice %263 {offsets = [0, 32], sizes = [1, 32], strides = [1, 1]} : vector<1x128xf32> to vector<1x32xf32>
    %267 = vector.extract_strided_slice %264 {offsets = [0, 64], sizes = [1, 32], strides = [1, 1]} : vector<1x128xf32> to vector<1x32xf32>
    %268 = vector.extract_strided_slice %263 {offsets = [0, 96], sizes = [1, 32], strides = [1, 1]} : vector<1x128xf32> to vector<1x32xf32>
    %269 = arith.mulf %266, %252 : vector<1x32xf32>
    %270 = arith.mulf %265, %267 : vector<1x32xf32>
    %271 = arith.addf %269, %270 : vector<1x32xf32>
    %272 = math.tanh %271 : vector<1x32xf32>
    %273 = arith.mulf %268, %272 : vector<1x32xf32>
    %c11 = arith.constant 11 : index
    %c0_69 = arith.constant 0 : index
    %274 = vector.load %arg18[%c11, %c0_69] : memref<16x32xf32, #tpu.memory_space<vmem>>, vector<1x32xf32>
    tpu.vector_store %arg18[%c11, %c0_69], %273 {strides = array<i32>} : memref<16x32xf32, #tpu.memory_space<vmem>>, vector<1x32xf32>,
    %275 = vector.extract_strided_slice %41 {offsets = [12, 0], sizes = [1, 128], strides = [1, 1]} : vector<16x128xf32> to vector<1x128xf32>
    %cst_70 = arith.constant dense<0.000000e+00> : vector<1x128xf32>
    %276 = tpu.matmul %273, %44, %cst_70 {dimension_numbers = #tpu.dot_dimension_numbers<[1], [0], [0], [1], [0, 0, 1, 1], [], []>} : vector<1x32xf32>, vector<32x128xf32>, vector<1x128xf32> -> vector<1x128xf32>
    %277 = arith.addf %275, %276 : vector<1x128xf32>
    %278 = arith.negf %277 : vector<1x128xf32>
    %279 = math.exp %278 : vector<1x128xf32>
    %cst_71 = arith.constant 1.000000e+00 : f32
    %280 = vector.broadcast %cst_71 : f32 to vector<1x128xf32>
    %281 = arith.addf %280, %279 : vector<1x128xf32>
    %282 = arith.divf %280, %281 : vector<1x128xf32>
    %283 = math.tanh %277 : vector<1x128xf32>
    %284 = vector.extract_strided_slice %282 {offsets = [0, 0], sizes = [1, 32], strides = [1, 1]} : vector<1x128xf32> to vector<1x32xf32>
    %285 = vector.extract_strided_slice %282 {offsets = [0, 32], sizes = [1, 32], strides = [1, 1]} : vector<1x128xf32> to vector<1x32xf32>
    %286 = vector.extract_strided_slice %283 {offsets = [0, 64], sizes = [1, 32], strides = [1, 1]} : vector<1x128xf32> to vector<1x32xf32>
    %287 = vector.extract_strided_slice %282 {offsets = [0, 96], sizes = [1, 32], strides = [1, 1]} : vector<1x128xf32> to vector<1x32xf32>
    %288 = arith.mulf %285, %271 : vector<1x32xf32>
    %289 = arith.mulf %284, %286 : vector<1x32xf32>
    %290 = arith.addf %288, %289 : vector<1x32xf32>
    %291 = math.tanh %290 : vector<1x32xf32>
    %292 = arith.mulf %287, %291 : vector<1x32xf32>
    %c12 = arith.constant 12 : index
    %c0_72 = arith.constant 0 : index
    %293 = vector.load %arg18[%c12, %c0_72] : memref<16x32xf32, #tpu.memory_space<vmem>>, vector<1x32xf32>
    tpu.vector_store %arg18[%c12, %c0_72], %292 {strides = array<i32>} : memref<16x32xf32, #tpu.memory_space<vmem>>, vector<1x32xf32>,
    %294 = vector.extract_strided_slice %41 {offsets = [13, 0], sizes = [1, 128], strides = [1, 1]} : vector<16x128xf32> to vector<1x128xf32>
    %cst_73 = arith.constant dense<0.000000e+00> : vector<1x128xf32>
    %295 = tpu.matmul %292, %44, %cst_73 {dimension_numbers = #tpu.dot_dimension_numbers<[1], [0], [0], [1], [0, 0, 1, 1], [], []>} : vector<1x32xf32>, vector<32x128xf32>, vector<1x128xf32> -> vector<1x128xf32>
    %296 = arith.addf %294, %295 : vector<1x128xf32>
    %297 = arith.negf %296 : vector<1x128xf32>
    %298 = math.exp %297 : vector<1x128xf32>
    %cst_74 = arith.constant 1.000000e+00 : f32
    %299 = vector.broadcast %cst_74 : f32 to vector<1x128xf32>
    %300 = arith.addf %299, %298 : vector<1x128xf32>
    %301 = arith.divf %299, %300 : vector<1x128xf32>
    %302 = math.tanh %296 : vector<1x128xf32>
    %303 = vector.extract_strided_slice %301 {offsets = [0, 0], sizes = [1, 32], strides = [1, 1]} : vector<1x128xf32> to vector<1x32xf32>
    %304 = vector.extract_strided_slice %301 {offsets = [0, 32], sizes = [1, 32], strides = [1, 1]} : vector<1x128xf32> to vector<1x32xf32>
    %305 = vector.extract_strided_slice %302 {offsets = [0, 64], sizes = [1, 32], strides = [1, 1]} : vector<1x128xf32> to vector<1x32xf32>
    %306 = vector.extract_strided_slice %301 {offsets = [0, 96], sizes = [1, 32], strides = [1, 1]} : vector<1x128xf32> to vector<1x32xf32>
    %307 = arith.mulf %304, %290 : vector<1x32xf32>
    %308 = arith.mulf %303, %305 : vector<1x32xf32>
    %309 = arith.addf %307, %308 : vector<1x32xf32>
    %310 = math.tanh %309 : vector<1x32xf32>
    %311 = arith.mulf %306, %310 : vector<1x32xf32>
    %c13 = arith.constant 13 : index
    %c0_75 = arith.constant 0 : index
    %312 = vector.load %arg18[%c13, %c0_75] : memref<16x32xf32, #tpu.memory_space<vmem>>, vector<1x32xf32>
    tpu.vector_store %arg18[%c13, %c0_75], %311 {strides = array<i32>} : memref<16x32xf32, #tpu.memory_space<vmem>>, vector<1x32xf32>,
    %313 = vector.extract_strided_slice %41 {offsets = [14, 0], sizes = [1, 128], strides = [1, 1]} : vector<16x128xf32> to vector<1x128xf32>
    %cst_76 = arith.constant dense<0.000000e+00> : vector<1x128xf32>
    %314 = tpu.matmul %311, %44, %cst_76 {dimension_numbers = #tpu.dot_dimension_numbers<[1], [0], [0], [1], [0, 0, 1, 1], [], []>} : vector<1x32xf32>, vector<32x128xf32>, vector<1x128xf32> -> vector<1x128xf32>
    %315 = arith.addf %313, %314 : vector<1x128xf32>
    %316 = arith.negf %315 : vector<1x128xf32>
    %317 = math.exp %316 : vector<1x128xf32>
    %cst_77 = arith.constant 1.000000e+00 : f32
    %318 = vector.broadcast %cst_77 : f32 to vector<1x128xf32>
    %319 = arith.addf %318, %317 : vector<1x128xf32>
    %320 = arith.divf %318, %319 : vector<1x128xf32>
    %321 = math.tanh %315 : vector<1x128xf32>
    %322 = vector.extract_strided_slice %320 {offsets = [0, 0], sizes = [1, 32], strides = [1, 1]} : vector<1x128xf32> to vector<1x32xf32>
    %323 = vector.extract_strided_slice %320 {offsets = [0, 32], sizes = [1, 32], strides = [1, 1]} : vector<1x128xf32> to vector<1x32xf32>
    %324 = vector.extract_strided_slice %321 {offsets = [0, 64], sizes = [1, 32], strides = [1, 1]} : vector<1x128xf32> to vector<1x32xf32>
    %325 = vector.extract_strided_slice %320 {offsets = [0, 96], sizes = [1, 32], strides = [1, 1]} : vector<1x128xf32> to vector<1x32xf32>
    %326 = arith.mulf %323, %309 : vector<1x32xf32>
    %327 = arith.mulf %322, %324 : vector<1x32xf32>
    %328 = arith.addf %326, %327 : vector<1x32xf32>
    %329 = math.tanh %328 : vector<1x32xf32>
    %330 = arith.mulf %325, %329 : vector<1x32xf32>
    %c14 = arith.constant 14 : index
    %c0_78 = arith.constant 0 : index
    %331 = vector.load %arg18[%c14, %c0_78] : memref<16x32xf32, #tpu.memory_space<vmem>>, vector<1x32xf32>
    tpu.vector_store %arg18[%c14, %c0_78], %330 {strides = array<i32>} : memref<16x32xf32, #tpu.memory_space<vmem>>, vector<1x32xf32>,
    %332 = vector.extract_strided_slice %41 {offsets = [15, 0], sizes = [1, 128], strides = [1, 1]} : vector<16x128xf32> to vector<1x128xf32>
    %cst_79 = arith.constant dense<0.000000e+00> : vector<1x128xf32>
    %333 = tpu.matmul %330, %44, %cst_79 {dimension_numbers = #tpu.dot_dimension_numbers<[1], [0], [0], [1], [0, 0, 1, 1], [], []>} : vector<1x32xf32>, vector<32x128xf32>, vector<1x128xf32> -> vector<1x128xf32>
    %334 = arith.addf %332, %333 : vector<1x128xf32>
    %335 = arith.negf %334 : vector<1x128xf32>
    %336 = math.exp %335 : vector<1x128xf32>
    %cst_80 = arith.constant 1.000000e+00 : f32
    %337 = vector.broadcast %cst_80 : f32 to vector<1x128xf32>
    %338 = arith.addf %337, %336 : vector<1x128xf32>
    %339 = arith.divf %337, %338 : vector<1x128xf32>
    %340 = math.tanh %334 : vector<1x128xf32>
    %341 = vector.extract_strided_slice %339 {offsets = [0, 0], sizes = [1, 32], strides = [1, 1]} : vector<1x128xf32> to vector<1x32xf32>
    %342 = vector.extract_strided_slice %339 {offsets = [0, 32], sizes = [1, 32], strides = [1, 1]} : vector<1x128xf32> to vector<1x32xf32>
    %343 = vector.extract_strided_slice %340 {offsets = [0, 64], sizes = [1, 32], strides = [1, 1]} : vector<1x128xf32> to vector<1x32xf32>
    %344 = vector.extract_strided_slice %339 {offsets = [0, 96], sizes = [1, 32], strides = [1, 1]} : vector<1x128xf32> to vector<1x32xf32>
    %345 = arith.mulf %342, %328 : vector<1x32xf32>
    %346 = arith.mulf %341, %343 : vector<1x32xf32>
    %347 = arith.addf %345, %346 : vector<1x32xf32>
    %348 = math.tanh %347 : vector<1x32xf32>
    %349 = arith.mulf %344, %348 : vector<1x32xf32>
    %c15 = arith.constant 15 : index
    %c0_81 = arith.constant 0 : index
    %350 = vector.load %arg18[%c15, %c0_81] : memref<16x32xf32, #tpu.memory_space<vmem>>, vector<1x32xf32>
    tpu.vector_store %arg18[%c15, %c0_81], %349 {strides = array<i32>} : memref<16x32xf32, #tpu.memory_space<vmem>>, vector<1x32xf32>,
    %c0_82 = arith.constant 0 : index
    %c0_83 = arith.constant 0 : index
    %351 = vector.load %arg16[%c0_82, %c0_83] : memref<1x32xf32, #tpu.memory_space<vmem>>, vector<1x32xf32>
    tpu.vector_store %arg16[%c0_82, %c0_83], %349 {strides = array<i32>} : memref<1x32xf32, #tpu.memory_space<vmem>>, vector<1x32xf32>,
    %c0_84 = arith.constant 0 : index
    %c0_85 = arith.constant 0 : index
    %352 = vector.load %arg17[%c0_84, %c0_85] : memref<1x32xf32, #tpu.memory_space<vmem>>, vector<1x32xf32>
    tpu.vector_store %arg17[%c0_84, %c0_85], %347 {strides = array<i32>} : memref<1x32xf32, #tpu.memory_space<vmem>>, vector<1x32xf32>,
    %c0_86 = arith.constant 0 : index
    %c0_87 = arith.constant 0 : index
    %353 = vector.load %arg18[%c0_86, %c0_87] : memref<16x32xf32, #tpu.memory_space<vmem>>, vector<16x32xf32>
    %c0_88 = arith.constant 0 : index
    %c0_89 = arith.constant 0 : index
    %354 = vector.load %arg8[%c0_88, %c0_89] : memref<32x33xf32, #tpu.memory_space<vmem>>, vector<32x33xf32>
    %cst_90 = arith.constant dense<0.000000e+00> : vector<16x33xf32>
    %355 = tpu.matmul %353, %354, %cst_90 {dimension_numbers = #tpu.dot_dimension_numbers<[1], [0], [0], [1], [0, 0, 1, 1], [], []>} : vector<16x32xf32>, vector<32x33xf32>, vector<16x33xf32> -> vector<16x33xf32>
    %c0_91 = arith.constant 0 : index
    %c0_92 = arith.constant 0 : index
    %356 = vector.load %arg14[%c0_91, %c0_92] : memref<1x33xf32, #tpu.memory_space<vmem>>, vector<1x33xf32>
    %357 = vector.broadcast %356 : vector<1x33xf32> to vector<16x33xf32>
    %358 = arith.addf %355, %357 : vector<16x33xf32>
    %359 = vector.extract_strided_slice %358 {offsets = [0, 32], sizes = [16, 1], strides = [1, 1]} : vector<16x33xf32> to vector<16x1xf32>
    %360 = arith.addf %359, %43 : vector<16x1xf32>
    %361 = arith.negf %360 : vector<16x1xf32>
    %362 = math.exp %361 : vector<16x1xf32>
    %cst_93 = arith.constant 1.000000e+00 : f32
    %363 = vector.broadcast %cst_93 : f32 to vector<16x1xf32>
    %364 = arith.addf %363, %362 : vector<16x1xf32>
    %365 = arith.divf %363, %364 : vector<16x1xf32>
    %366 = vector.extract_strided_slice %358 {offsets = [0, 0], sizes = [16, 32], strides = [1, 1]} : vector<16x33xf32> to vector<16x32xf32>
    %367 = arith.addf %366, %42 : vector<16x32xf32>
    %cst_94 = arith.constant dense<0xFF800000> : vector<16xf32>
    %368 = vector.multi_reduction <maximumf>, %367, %cst_94 [1] : vector<16x32xf32> to vector<16xf32>
    %369 = vector.shape_cast %368 : vector<16xf32> to vector<16x1xf32>
    %370 = vector.broadcast %369 : vector<16x1xf32> to vector<16x32xf32>
    %371 = arith.subf %367, %370 : vector<16x32xf32>
    %372 = math.exp %371 : vector<16x32xf32>
    %cst_95 = arith.constant dense<0.000000e+00> : vector<16xf32>
    %373 = vector.multi_reduction <add>, %372, %cst_95 [1] : vector<16x32xf32> to vector<16xf32>
    %374 = vector.shape_cast %373 : vector<16xf32> to vector<16x1xf32>
    %375 = math.log %374 : vector<16x1xf32>
    %376 = vector.broadcast %375 : vector<16x1xf32> to vector<16x32xf32>
    %377 = arith.subf %371, %376 : vector<16x32xf32>
    %cst_96 = arith.constant dense<0xFF800000> : vector<16xf32>
    %378 = vector.multi_reduction <maximumf>, %34, %cst_96 [1] : vector<16x32xf32> to vector<16xf32>
    %379 = vector.shape_cast %378 : vector<16xf32> to vector<16x1xf32>
    %380 = vector.broadcast %379 : vector<16x1xf32> to vector<16x32xf32>
    %381 = arith.subf %34, %380 : vector<16x32xf32>
    %382 = math.exp %381 : vector<16x32xf32>
    %cst_97 = arith.constant dense<0.000000e+00> : vector<16xf32>
    %383 = vector.multi_reduction <add>, %382, %cst_97 [1] : vector<16x32xf32> to vector<16xf32>
    %384 = vector.shape_cast %383 : vector<16xf32> to vector<16x1xf32>
    %385 = tpu.reciprocal %384 {approx = true} : vector<16x1xf32> -> vector<16x1xf32>
    %386 = vector.broadcast %385 : vector<16x1xf32> to vector<16x32xf32>
    %387 = arith.mulf %382, %386 : vector<16x32xf32>
    %388 = vector.broadcast %365 : vector<16x1xf32> to vector<16x32xf32>
    %389 = arith.mulf %388, %387 : vector<16x32xf32>
    %cst_98 = arith.constant 1.000000e+00 : f32
    %390 = vector.broadcast %cst_98 : f32 to vector<16x1xf32>
    %391 = arith.subf %390, %365 : vector<16x1xf32>
    %392 = vector.broadcast %391 : vector<16x1xf32> to vector<16x32xf32>
    %393 = arith.mulf %392, %377 : vector<16x32xf32>
    %394 = arith.addf %389, %393 : vector<16x32xf32>
    %c0_99 = arith.constant 0 : index
    %c0_100 = arith.constant 0 : index
    %395 = vector.load %arg15[%c0_99, %c0_100] : memref<16x32xf32, #tpu.memory_space<vmem>>, vector<16x32xf32>
    tpu.vector_store %arg15[%c0_99, %c0_100], %394 {strides = array<i32>} : memref<16x32xf32, #tpu.memory_space<vmem>>, vector<16x32xf32>,
    return
  }
}

</mosaic_0001>

<bundles_post_ra>
// kernel: tpu_custom_call.1
= control target key start
LH: loop header
LB: loop body
LE: loop exit
PB: predicated region body
PF: predicated region fallthrough
CT: control target
= control target key end

     0   :  { %s4517_s0 = inlined_call_operand.hbm [shape: f32[16,32], index: 0, kind: input, shape index: {}]   ;;  %s4518_s1 = inlined_call_operand.hbm [shape: f32[16,32], index: 1, kind: input, shape index: {}]   ;;  %s4519_s2 = inlined_call_operand.vmem [shape: f32[1,32], index: 2, kind: input, shape index: {}]   ;;  %s4520_s3 = inlined_call_operand.vmem [shape: f32[1,32], index: 3, kind: input, shape index: {}]   ;;  %s4521_s4 = inlined_call_operand.hbm [shape: f32[32,160], index: 4, kind: input, shape index: {}]   ;;  %s4522_s5 = inlined_call_operand.hbm [shape: f32[32,64], index: 5, kind: input, shape index: {}]   ;;  %s4523_s6 = inlined_call_operand.hbm [shape: f32[32,32], index: 6, kind: input, shape index: {}]   ;;  %s4524_s7 = inlined_call_operand.hbm [shape: f32[32,161], index: 7, kind: input, shape index: {}]   ;;  %s4525_s8 = inlined_call_operand.hbm [shape: f32[32,33], index: 8, kind: input, shape index: {}]   ;;  %s4526_s9 = inlined_call_operand.vmem [shape: f32[32,128], index: 9, kind: input, shape index: {}]   ;;  %s4527_s10 = inlined_call_operand.vmem [shape: f32[1,32], index: 10, kind: input, shape index: {}]   ;;  %s4528_s11 = inlined_call_operand.vmem [shape: f32[1,64], index: 11, kind: input, shape index: {}]   ;;  %s4529_s12 = inlined_call_operand.vmem [shape: f32[1,32], index: 12, kind: input, shape index: {}]   ;;  %s4530_s13 = inlined_call_operand.vmem [shape: f32[1,128], index: 13, kind: input, shape index: {}]   ;;  %s4531_s14 = inlined_call_operand.vmem [shape: f32[1,33], index: 14, kind: input, shape index: {}]   ;;  %s4532_s15 = inlined_call_operand.hbm [shape: f32[16,32], index: 15, kind: output, shape index: {0}]   ;;  %s4533_s16 = inlined_call_operand.hbm [shape: f32[1,32], index: 16, kind: output, shape index: {1}]   ;;  %s4534_s17 = inlined_call_operand.hbm [shape: f32[1,32], index: 17, kind: output, shape index: {2}]  }
   0x1   :  { %4539 = sst [smem:[#allocation25_spill]] %s4517_s0 }
   0x2   :  { %4540 = sst [smem:[#allocation26_spill]] %s4518_s1 }
   0x3   :  { %4541 = sst [smem:[#allocation27_spill]] %s4532_s15 }
   0x4   :  { %23 = vsyncpa [#allocation4], 0 }
   0x5   :  { %24 = vsyncpa [#allocation7], 0 }
   0x6   :  { %25 = vsyncpa [#allocation10], 0 }
   0x7   :  { %26 = vsyncpa [#allocation13], 0 }
   0x8   :  { %27 = vsyncpa [#allocation5], 0 }
   0x9   :  { %28 = vsyncpa [#allocation17], 0  ;;  %s3876_s24 = smov [#allocation6]   ;;  %s3877_s26 = smov [#allocation9]  }
   0xa   :  { %s46_s25 = sshll.u32 %s3876_s24, 4  ;;  %s74_s27 = sshll.u32 %s3877_s26, 4  ;;  %s47_s25 = int_to_ptr.vmem [resolvable:$true] %s46_s25  ;;  %s3987_s27 = int_to_ptr.vmem [resolvable:$true] %s74_s27 }
   0xb   :  { %s4542_s0 = sld [smem:[#allocation26_spill]] }
  0x11   :  { %s3644_s30 = scalar_lea.hbm %s4542_s0, 256 }
  0x12   :  { %p3645_p0 = scmp.ne.s32.totalorder %s4542_s0, %s3644_s30  ;;  %p3648_p1 = scmp.lt.u32.totalorder %s3644_s30, %s4542_s0 }
  0x14   :  { %p3650_p2 = pnand %p3648_p1, %p3645_p0 }
  0x16   :  { %3653 = shalt.err (!%p3650_p2)
}
  0x17   :  { %s3654_s21 = scalar_lea.vmem %s47_s25, 256  ;;  %p3659_p4 = scmp.lt.s32.totalorder %s47_s25, %s47_s25 }
  0x18   :  { %p3655_p3 = scmp.ne.s32.totalorder %s47_s25, %s3654_s21  ;;  %p3660_p5 = scmp.lt.s32.totalorder %s3654_s21, %s3654_s21 }
  0x1a   :  { %p3661_p6 = por %p3660_p5, %p3659_p4 }
  0x1c   :  { %p3662_p7 = pnand %p3661_p6, %p3655_p3 }
  0x1e   :  { %3665 = shalt.err (!%p3662_p7)
}
  0x1f   :  { %s3878_s22 = smov 128   ;;  %s3879_s23 = smov 8  }
  0x20   :  { %52 = dma.hbm_to_vmem [thread:$0]  %s4542_s0, 256, %s47_s25, [#allocation7], %s3878_s22, %s3878_s22, %s3879_s23  }
  0x21   :  { %s3666_s30 = scalar_lea.hbm %s4522_s5, 512 }
  0x22   :  { %p3667_p8 = scmp.ne.s32.totalorder %s4522_s5, %s3666_s30  ;;  %p3670_p9 = scmp.lt.u32.totalorder %s3666_s30, %s4522_s5 }
  0x24   :  { %p3672_p10 = pnand %p3670_p9, %p3667_p8 }
  0x26   :  { %3675 = shalt.err (!%p3672_p10)
}
  0x27   :  { %s3676_s21 = scalar_lea.vmem %s3987_s27, 512  ;;  %p3681_p12 = scmp.lt.s32.totalorder %s3987_s27, %s3987_s27 }
  0x28   :  { %p3677_p11 = scmp.ne.s32.totalorder %s3987_s27, %s3676_s21  ;;  %p3682_p13 = scmp.lt.s32.totalorder %s3676_s21, %s3676_s21 }
  0x2a   :  { %p3683_p0 = por %p3682_p13, %p3681_p12 }
  0x2c   :  { %p3684_p1 = pnand %p3683_p0, %p3677_p11 }
  0x2e   :  { %3687 = shalt.err (!%p3684_p1)
}
  0x2f   :  { %80 = dma.hbm_to_vmem [thread:$0]  %s4522_s5, 512, %s3987_s27, [#allocation10], %s3878_s22, %s3878_s22, %s3879_s23  }
  0x30   :  { %s3880_s24 = smov [#allocation12]   ;;  %s3881_s28 = smov [#allocation3]  }
  0x31   :  { %s98_s26 = sshll.u32 %s3880_s24, 4  ;;  %s34_s29 = sshll.u32 %s3881_s28, 4  ;;  %s99_s26 = int_to_ptr.vmem [resolvable:$true] %s98_s26  ;;  %s4024_s29 = int_to_ptr.vmem [resolvable:$true] %s34_s29 }
  0x32   :  { %s3688_s19 = scalar_lea.hbm %s4524_s7, 1024 }
  0x33   :  { %p3689_p2 = scmp.ne.s32.totalorder %s4524_s7, %s3688_s19  ;;  %p3692_p3 = scmp.lt.u32.totalorder %s3688_s19, %s4524_s7 }
  0x35   :  { %p3694_p4 = pnand %p3692_p3, %p3689_p2 }
  0x37   :  { %3697 = shalt.err (!%p3694_p4)
}
  0x38   :  { %s3698_s5 = scalar_lea.vmem %s99_s26, 1024  ;;  %p3703_p6 = scmp.lt.s32.totalorder %s99_s26, %s99_s26 }
  0x39   :  { %p3699_p5 = scmp.ne.s32.totalorder %s99_s26, %s3698_s5  ;;  %p3704_p7 = scmp.lt.s32.totalorder %s3698_s5, %s3698_s5 }
  0x3b   :  { %p3705_p8 = por %p3704_p7, %p3703_p6 }
  0x3d   :  { %p3706_p9 = pnand %p3705_p8, %p3699_p5 }
  0x3f   :  { %3709 = shalt.err (!%p3706_p9)
}
  0x40   :  { %s4538_s27 = smov 256   ;;  %s3883_s25 = smov 16  }
  0x41   :  { %104 = dma.hbm_to_vmem [thread:$0]  %s4524_s7, 1024, %s99_s26, [#allocation13], %s4538_s27, %s4538_s27, %s3883_s25  }
  0x42   :  { %s4543_s30 = sld [smem:[#allocation25_spill]] }
  0x48   :  { %s3710_s18 = scalar_lea.hbm %s4543_s30, 256 }
  0x49   :  { %p3711_p10 = scmp.ne.s32.totalorder %s4543_s30, %s3710_s18  ;;  %p3714_p11 = scmp.lt.u32.totalorder %s3710_s18, %s4543_s30 }
  0x4b   :  { %p3716_p12 = pnand %p3714_p11, %p3711_p10 }
  0x4d   :  { %3719 = shalt.err (!%p3716_p12)
}
  0x4e   :  { %s3720_s5 = scalar_lea.vmem %s4024_s29, 256  ;;  %p3725_p0 = scmp.lt.s32.totalorder %s4024_s29, %s4024_s29 }
  0x4f   :  { %p3721_p13 = scmp.ne.s32.totalorder %s4024_s29, %s3720_s5  ;;  %p3726_p1 = scmp.lt.s32.totalorder %s3720_s5, %s3720_s5 }
  0x51   :  { %p3727_p2 = por %p3726_p1, %p3725_p0 }
  0x53   :  { %p3728_p3 = pnand %p3727_p2, %p3721_p13 }
  0x55   :  { %3731 = shalt.err (!%p3728_p3)
}
  0x56   :  { %40 = dma.hbm_to_vmem [thread:$0]  %s4543_s30, 256, %s4024_s29, [#allocation4], %s3878_s22, %s3878_s22, %s3879_s23  }
  0x57   :  { %s3884_s0 = smov [#allocation8]   ;;  %s3885_s15 = smov [#allocation11]  }
  0x58   :  { %s62_s24 = sshll.u32 %s3884_s0, 4  ;;  %s86_s28 = sshll.u32 %s3885_s15, 4  ;;  %s63_s24 = int_to_ptr.vmem [resolvable:$true] %s62_s24  ;;  %s4061_s28 = int_to_ptr.vmem [resolvable:$true] %s86_s28 }
  0x59   :  { %s3732_s1 = scalar_lea.hbm %s4521_s4, 1024 }
  0x5a   :  { %p3733_p4 = scmp.ne.s32.totalorder %s4521_s4, %s3732_s1  ;;  %p3736_p5 = scmp.lt.u32.totalorder %s3732_s1, %s4521_s4 }
  0x5c   :  { %p3738_p6 = pnand %p3736_p5, %p3733_p4 }
  0x5e   :  { %3741 = shalt.err (!%p3738_p6)
}
  0x5f   :  { %s3742_s29 = scalar_lea.vmem %s63_s24, 1024  ;;  %p3747_p8 = scmp.lt.s32.totalorder %s63_s24, %s63_s24 }
  0x60   :  { %p3743_p7 = scmp.ne.s32.totalorder %s63_s24, %s3742_s29  ;;  %p3748_p9 = scmp.lt.s32.totalorder %s3742_s29, %s3742_s29 }
  0x62   :  { %p3749_p10 = por %p3748_p9, %p3747_p8 }
  0x64   :  { %p3750_p11 = pnand %p3749_p10, %p3743_p7 }
  0x66   :  { %3753 = shalt.err (!%p3750_p11)
}
  0x67   :  { %s4544_s30 = smov 256   ;;  %s3754_s27 = scalar_lea.hbm %s4523_s6, 512 }
  0x68   :  { %68 = dma.hbm_to_vmem [thread:$0]  %s4521_s4, 1024, %s63_s24, [#allocation7], %s4544_s30, %s4544_s30, %s3883_s25  }
  0x69   :  { %p3755_p12 = scmp.ne.s32.totalorder %s4523_s6, %s3754_s27  ;;  %p3758_p13 = scmp.lt.u32.totalorder %s3754_s27, %s4523_s6 }
  0x6b   :  { %p3760_p0 = pnand %p3758_p13, %p3755_p12 }
  0x6d   :  { %3763 = shalt.err (!%p3760_p0)
}
  0x6e   :  { %s3764_s21 = scalar_lea.vmem %s4061_s28, 512  ;;  %p3769_p2 = scmp.lt.s32.totalorder %s4061_s28, %s4061_s28 }
  0x6f   :  { %p3765_p1 = scmp.ne.s32.totalorder %s4061_s28, %s3764_s21  ;;  %p3770_p3 = scmp.lt.s32.totalorder %s3764_s21, %s3764_s21 }
  0x71   :  { %p3771_p4 = por %p3770_p3, %p3769_p2 }
  0x73   :  { %p3772_p5 = pnand %p3771_p4, %p3765_p1 }
  0x75   :  { %3775 = shalt.err (!%p3772_p5)
}
  0x76   :  { %92 = dma.hbm_to_vmem [thread:$0]  %s4523_s6, 512, %s4061_s28, [#allocation10], %s3878_s22, %s3878_s22, %s3879_s23  }
  0x77   :  { %s3886_s24 = smov [#allocation14]   ;;  %s3776_s7 = scalar_lea.hbm %s4525_s8, 512 }
  0x78   :  { %s110_s5 = sshll.u32 %s3886_s24, 4  ;;  %p3777_p6 = scmp.ne.s32.totalorder %s4525_s8, %s3776_s7  ;;  %s111_s5 = int_to_ptr.vmem [resolvable:$true] %s110_s5 }
  0x79   :  { %p3780_p7 = scmp.lt.u32.totalorder %s3776_s7, %s4525_s8 }
  0x7b   :  { %p3782_p8 = pnand %p3780_p7, %p3777_p6 }
  0x7d   :  { %3785 = shalt.err (!%p3782_p8)
}
  0x7e   :  { %s3786_s18 = scalar_lea.vmem %s111_s5, 512  ;;  %p3791_p10 = scmp.lt.s32.totalorder %s111_s5, %s111_s5 }
  0x7f   :  { %p3787_p9 = scmp.ne.s32.totalorder %s111_s5, %s3786_s18  ;;  %p3792_p11 = scmp.lt.s32.totalorder %s3786_s18, %s3786_s18 }
  0x81   :  { %p3793_p12 = por %p3792_p11, %p3791_p10 }
  0x83   :  { %p3794_p13 = pnand %p3793_p12, %p3787_p9 }
  0x85   :  { %3797 = shalt.err (!%p3794_p13)
}
  0x86   :  { %116 = dma.hbm_to_vmem [thread:$0]  %s4525_s8, 512, %s111_s5, [#allocation13], %s3878_s22, %s3878_s22, %s3879_s23  }
  0x87   :  { %3864 = dma.done.wait [#allocation4], 256  }
  0x88   :  { %3865 = vsyncadd [#allocation4], 4294967040 }
  0x89   :  { %3866 = dma.done.wait [#allocation7], 1280  }
  0x8a   :  { %3867 = vsyncadd [#allocation7], 4294966016 }
  0x8b   :  { %3868 = dma.done.wait [#allocation10], 1024  }
  0x8c   :  { %3869 = vsyncadd [#allocation10], 4294966272 }
  0x8d   :  { %3870 = dma.done.wait [#allocation13], 1536  }
  0x8e   :  { %3871 = vsyncadd [#allocation13], 4294965760  ;;  %v3887_v0 = vmov 0.0   ;;  %v257_v1 = vld [vmem:[#allocation9] sm:$0xff]  ;;  %v258_v2 = vld [vmem:[#allocation9 + $0x8] sm:$0xff]  ;;  %vm162_vm0 = vcmask 261120  }
  0x8f   :  { %233 = vmatprep.mubr.f32.mxu0 %v3887_v0  ;;  %v259_v3 = vld [vmem:[#allocation9 + $0x10] sm:$0xff]  ;;  %v3254_v4 = vpack.c.bf16 %v258_v2, %v257_v1  ;;  %v260_v5 = vld [vmem:[#allocation9 + $0x18] sm:$0xff]  ;;  %v155_v6 = vld [vmem:[#allocation8 + $0x8] sm:$0xff]  ;;  %vm436_vm2 = vcmask 130048   ;;  %vm3890_vm3 = vmmov 0   ;;  %s3891_s15 = smov 32  }
  0x90   :  { %v157_v7 = vld [vmem:[#allocation8 + $0x18] sm:$0xff]  ;;  %v3258_v8 = vpack.c.bf16 %v260_v5, %v259_v3  ;;  %v154_v10 = vld [vmem:[#allocation8] sm:$0xff]  ;;  %v156_v11 = vld [vmem:[#allocation8 + $0x10] sm:$0xff]  ;;  %s3892_s18 = smov 64   ;;  %vm877_vm4 = vcmask 253952   ;;  %vm992_vm5 = vcmask 254977  }
  0x91   :  { %v3246_v9 = vpack.c.bf16 %v157_v7, %v155_v6  ;;  %v152_v12 = vld [vmem:[#allocation6] sm:$0xff]  ;;  %3255 = vmatprep.subr.bf16.mxu1 %v3254_v4  ;;  %v3248_v13 = vpack.c.bf16 %v156_v11, %v154_v10  ;;  %v159_v14 = vld [vmem:[#allocation8 + $0x28] sm:$0xff]  ;;  %v161_v15 = vld [vmem:[#allocation8 + $0x38] sm:$0xff]  ;;  %vm1108_vm6 = vcmask 256002   ;;  %vm1224_vm7 = vcmask 257027  }
  0x92   :  { %3031 = vmatprep.mubr.msk.f32.mxu1 %vm162_vm0, %v152_v12  ;;  %3257 = vmatpush3.bf16.msra.mxu1 %v3254_v4  ;;  %v3250_v16 = vpack.c.bf16 %v161_v15, %v159_v14  ;;  %v158_v17 = vld [vmem:[#allocation8 + $0x20] sm:$0xff]  ;;  %v160_v18 = vld [vmem:[#allocation8 + $0x30] sm:$0xff]  ;;  %v153_v20 = vld [vmem:[#allocation6 + $0x8] sm:$0xff]  ;;  %vm1340_vm8 = vcmask 258052   ;;  %vm1456_vm9 = vcmask 259077   ;;  %vm1572_vm10 = vcmask 260102  }
  0x93   :  { %3247 = vmatprep.subr.bf16.mxu0 %v3246_v9  ;;  %3259 = vmatprep.subr.bf16.mxu1 %v3258_v8  ;;  %v3252_v19 = vpack.c.bf16 %v160_v18, %v158_v17  ;;  %v150_v21 = vld [vmem:[#allocation3] sm:$0xff]  ;;  %v151_v22 = vld [vmem:[#allocation3 + $0x8] sm:$0xff]  ;;  %v2848_v23 = vld [vmem:[%s4528_s11] ss:$0 sm:$0xff]  ;;  %vm1688_vm11 = vcmask 261127  }
  0x94   :  { %3249 = vmatpush1.bf16.msra.mxu0 %v3248_v13  ;;  %v2847_v24 = vld [vmem:[%s4527_s10] ss:$0 sm:$0xff]  ;;  %vm3263_vm1 = vmpackc.low %vm162_vm0, %vm162_vm0  ;;  %s3888_s10 = smov 96   ;;  %v546_v57 = vld [vmem:[#allocation11] sm:$0xff] }
  0x95   :  { %3251 = vmatprep.subr.bf16.mxu0 %v3250_v16  ;;  %v547_v58 = vld [vmem:[#allocation11 + $0x8] sm:$0xff]  ;;  %v548_v1 = vld [vmem:[#allocation11 + $0x10] sm:$0xff]  ;;  %v549_v2 = vld [vmem:[#allocation11 + $0x18] sm:$0xff] }
  0x96   :  { %3261 = vmatpush3.bf16.msra.mxu1 %v3258_v8  ;;  %v3272_v59 = vpack.c.bf16 %v547_v58, %v546_v57  ;;  %v3276_v5 = vpack.c.bf16 %v549_v2, %v548_v1  ;;  %v639_v6 = vld [vmem:[#allocation12 + $0x8] sm:$0xff]  ;;  %v641_v7 = vld [vmem:[#allocation12 + $0x18] sm:$0xff]  ;;  %v638_v8 = vld [vmem:[#allocation12] sm:$0xff] }
  0x97   :  { %v3280_v9 = vpack.c.bf16 %v641_v7, %v639_v6  ;;  %v640_v10 = vld [vmem:[#allocation12 + $0x10] sm:$0xff]  ;;  %v643_v14 = vld [vmem:[#allocation12 + $0x28] sm:$0xff]  ;;  %v645_v15 = vld [vmem:[#allocation12 + $0x38] sm:$0xff] }
  0x98   :  { %3253 = vmatpush1.bf16.msra.mxu0 %v3252_v19  ;;  %v3282_v11 = vpack.c.bf16 %v640_v10, %v638_v8  ;;  %v754_v16 = vld [vmem:[%s4526_s9] sm:$0xff]  ;;  %v3284_v17 = vpack.c.bf16 %v645_v15, %v643_v14  ;;  %v642_v18 = vld [vmem:[#allocation12 + $0x20] sm:$0xff] }
  0x99   :  { %3032 = vmatmul.mubr.msk.f32.vlgmr.msra.gmra.mrb[0].mxu1 %vm162_vm0, %v153_v20  ;;  %v644_v19 = vld [vmem:[#allocation12 + $0x30] sm:$0xff]  ;;  %v755_v20 = vld [vmem:[%s4526_s9 + $0x8] sm:$0xff] }
  0x9b   :  { %2845 = vmatmul.mubr.msk.f32.vlgmr.msra.gmra.mrb[0].mxu0 %vm162_vm0, %v150_v21  ;;  %v3889_v21 = vmov 0.0|0.0  }
  0x9c   :  { %239 = vmatprep.mubr.f32.mxu0 %v3887_v0 }
  0x9f   :  { %2846 = vmatmul.mubr.msk.f32.gmra.mrb[2].mxu0 %vm162_vm0, %v151_v22  ;;  %v3286_v22 = vpack.c.bf16 %v644_v19, %v642_v18 }
 0x16c   :  { %v3033_v25 = vpop.f32.mrb[0].mxu1 }
 0x16d   :  { %v346_v26 = vadd.f32 %v3033_v25, %v2848_v23  ;;  %v340_v27 = vpop.f32.mrb[1].mxu1  ;;  %v757_v25 = vld [vmem:[%s4526_s9 + $0x18] sm:$0xff] }
 0x16e   :  { %v4125_v28 = vpop.f32.mrb[0].mxu0  ;;  %v341_v29 = vadd.f32 %v2848_v23, %v340_v27  ;;  %v4155_v23 = vpack.c.bf16 %v755_v20, %v754_v16  ;;  %v758_v27 = vld [vmem:[%s4519_s2] sm:$0x1] }
 0x16f   :  { %v253_v30 = vadd.f32 %v2847_v24, %v4125_v28  ;;  %v4128_v31 = vpop.f32.mrb[1].mxu0 }
 0x170   :  { %v3413_v32 = vpack.i.bf16 %v346_v26, %v341_v29  ;;  %v3262_v33 = vpack.c.bf16 %v346_v26, %v341_v29  ;;  %v2862_v29 = vld [vmem:[%s4530_s13] ss:$0 sm:$0xff] }
 0x171   :  { %v255_v34 = vmul.f32 0.17677669, %v253_v30  ;;  %v2857_v30 = vld [vmem:[%s4529_s12] ss:$0 sm:$0xff] }
 0x172   :  { %v4132_v35 = vpop.f32.mrb[2].mxu0  ;;  %3264 = vmatprep.subr.msk.bf16.mxu0 %vm3263_vm1, %v3262_v33 }
 0x173   :  { %v254_v36 = vadd.f32 %v2847_v24, %v4132_v35  ;;  %v4135_v37 = vpop.f32.mrb[3].mxu0  ;;  %3038 = vmatprep.mubr.msk.f32.mxu0 %vm162_vm0, %v255_v34  ;;  %3267 = vmatpush3.bf16.xpose.msk.msra.mxu0 %vm3263_vm1, %v3262_v33  ;;  %v756_v24 = vld [vmem:[%s4526_s9 + $0x10] sm:$0xff] }
 0x174   :  { %3281 = vmatprep.subr.bf16.mxu0 %v3280_v9  ;;  %v4165_v26 = vpack.c.bf16 %v757_v25, %v756_v24 }
 0x175   :  { %v256_v38 = vmul.f32 0.17677669, %v254_v36 }
 0x17a   :  { %3039 = vmatmul.mubr.msk.f32.vlgmr.msra.gmra.mrb[4].mxu0 %vm162_vm0, %v256_v38 }
 0x17b   :  { %716 = vmatprep.mubr.f32.mxu0 %v3887_v0  ;;  %3283 = vmatpush1.bf16.msra.mxu0 %v3282_v11 }
 0x17c   :  { %3285 = vmatprep.subr.bf16.mxu0 %v3284_v17 }
 0x17f   :  { %3287 = vmatpush1.bf16.msra.mxu0 %v3286_v22 }
 0x180   :  { %3294 = vmatprep.subr.bf16.mxu0 %v3889_v21 }
 0x24d   :  { %v3040_v39 = vpop.f32.mrb[4].mxu0 }
 0x24e   :  { %v427_v40 = vpop.f32.mrb[5].mxu0  ;;  %v440_v42 = vsel %vm436_vm2, %v3040_v39, -inf }
 0x24f   :  { %v437_v41 = vsel %vm436_vm2, %v427_v40, -inf }
 0x250   :  { %438 = vmax.xlane.f32.xlu0 %v437_v41 }
 0x254   :  { %441 = vmax.xlane.f32.xlu0 %v440_v42 }
 0x26a   :  { %3414 = vrot.lane.b32.xlu0 %v3413_v32, %s3888_s10 }
 0x2dd   :  { %v439_v43 = vpop.xlane.xlu0 %438 }
 0x2de   :  { %v443_v44 = vsub.f32 %v427_v40, %v439_v43 }
 0x2e0   :  { %v445_v45 = vmul.f32 1.442695, %v443_v44  ;;  %v2866_v44 = vld [vmem:[%s4520_s3] ss:$0 sm:$0xff] }
 0x2e1   :  { %v442_v46 = vpop.xlane.xlu0 %441 }
 0x2e2   :  { %3420 = vpow2.f32 %v445_v45  ;;  %v444_v47 = vsub.f32 %v3040_v39, %v442_v46 }
 0x2e4   :  { %v447_v48 = vmul.f32 1.442695, %v444_v47 }
 0x2e5   :  { %v3415_v49 = vpop.permute.xlu0 %3414 }
 0x2e6   :  { %3422 = vpow2.f32 %v447_v48  ;;  %v3417_v50 = vunpack.i.h.bf16 %v3415_v49  ;;  %v3416_v51 = vunpack.i.l.bf16 %v3415_v49 }
 0x2e8   :  { %v3268_v52 = vpack.c.bf16 %v3417_v50, %v3416_v51 }
 0x2ea   :  { %3269 = vmatprep.subr.bf16.mxu1 %v3268_v52 }
 0x2eb   :  { %3271 = vmatpush3.bf16.msra.mxu1 %v3268_v52 }
 0x2ec   :  { %v3421_v53 = vpop.eup %3420  ;;  %3273 = vmatprep.subr.bf16.mxu1 %v3272_v59 }
 0x2ed   :  { %v449_v54 = vsel %vm436_vm2, %v3421_v53, 0.0 }
 0x2ee   :  { %450 = vadd.xlane.f32.xlu1 %v449_v54 }
 0x2f0   :  { %v3423_v55 = vpop.eup %3422 }
 0x2f1   :  { %v452_v56 = vsel %vm436_vm2, %v3423_v55, 0.0 }
 0x2f2   :  { %453 = vadd.xlane.f32.xlu1 %v452_v56 }
 0x303   :  { %747 = vrot.lane.b32.xlu1 %v2862_v29, %s3891_s15 }
 0x37b   :  { %v451_v60 = vpop.xlane.xlu1 %450 }
 0x37c   :  { %3424 = vrcp.f32 %v451_v60 }
 0x37f   :  { %v454_v61 = vpop.xlane.xlu1 %453 }
 0x380   :  { %3426 = vrcp.f32 %v454_v61 }
 0x383   :  { %v4216_v45 = vpop.permute.xlu1 %747 }
 0x386   :  { %v3425_v62 = vpop.eup %3424 }
 0x387   :  { %v457_v63 = vmul.f32 %v3425_v62, %v3421_v53 }
 0x389   :  { %3045 = vmatprep.mubr.msk.f32.mxu1 %vm436_vm2, %v457_v63 }
 0x38a   :  { %v3427_v3 = vpop.eup %3426 }
 0x38b   :  { %v458_v4 = vmul.f32 %v3427_v3, %v3423_v55 }
 0x38d   :  { %3046 = vmatmul.mubr.msk.f32.vlgmr.msra.gmra.mrb[2].mxu1 %vm436_vm2, %v458_v4 }
 0x38e   :  { %3275 = vmatpush3.bf16.msra.mxu1 %v3272_v59 }
 0x38f   :  { %3277 = vmatprep.subr.bf16.mxu1 %v3276_v5 }
 0x392   :  { %3279 = vmatpush3.bf16.msra.mxu1 %v3276_v5 }
 0x393   :  { %3288 = vmatprep.subr.bf16.mxu1 %v3889_v21 }
 0x460   :  { %v3047_v12 = vpop.f32.mrb[2].mxu1 }
 0x461   :  { %v537_v13 = vpop.f32.mrb[3].mxu1 }
 0x462   :  { %3056 = vmatprep.mubr.msk.f32.mxu1 %vm162_vm0, %v537_v13 }
 0x463   :  { %3057 = vmatmul.mubr.msk.f32.vlgmr.msra.gmra.mrb[4].mxu1 %vm162_vm0, %v3047_v12 }
 0x464   :  { %3290 = vmatpush3.bf16.msra.mxu1 %v4155_v23  ;;  %3067 = vmatprep.mubr.msk.f32.mxu1 %vm3890_vm3, %v3887_v0 }
 0x465   :  { %3291 = vmatprep.subr.bf16.mxu1 %v3889_v21 }
 0x468   :  { %3293 = vmatpush3.bf16.msra.mxu1 %v4165_v26 }
 0x469   :  { %3300 = vmatprep.subr.bf16.mxu1 %v3889_v21 }
 0x46b   :  { %3068 = vmatmul.mubr.msk.f32.vlgmr.msra.gmra.mrb[6].mxu1 %vm162_vm0, %v758_v27 }
 0x46c   :  { %3302 = vmatpush3.bf16.msra.mxu1 %v4155_v23  ;;  %3089 = vmatprep.mubr.msk.f32.mxu1 %vm3890_vm3, %v3887_v0 }
 0x46d   :  { %3303 = vmatprep.subr.bf16.mxu1 %v3889_v21 }
 0x470   :  { %3305 = vmatpush3.bf16.msra.mxu1 %v4165_v26 }
 0x471   :  { %3312 = vmatprep.subr.bf16.mxu1 %v3889_v21 }
 0x536   :  { %v3058_v32 = vpop.f32.mrb[4].mxu1 }
 0x537   :  { %v629_v33 = vpop.f32.mrb[5].mxu1  ;;  %v4195_v36 = vadd.f32 %v3058_v32, %v2857_v30 }
 0x538   :  { %v4189_v34 = vadd.f32 %v2857_v30, %v629_v33 }
 0x53a   :  { %2860 = vmatmul.mubr.msk.f32.vlgmr.msra.gmra.mrb[6].mxu0 %vm162_vm0, %v4189_v34 }
 0x53b   :  { %722 = vmatprep.mubr.f32.mxu0 %v3887_v0  ;;  %3296 = vmatpush3.bf16.msra.mxu0 %v4155_v23 }
 0x53c   :  { %3297 = vmatprep.subr.bf16.mxu0 %v3889_v21 }
 0x53e   :  { %2861 = vmatmul.mubr.msk.f32.gmra.mrb[8].mxu0 %vm162_vm0, %v4195_v36  ;;  %v829_v38 = vpop.f32.mrb[6].mxu1 }
 0x53f   :  { %3299 = vmatpush3.bf16.msra.mxu0 %v4165_v26  ;;  %3078 = vmatprep.mubr.msk.f32.mxu0 %vm3890_vm3, %v3887_v0  ;;  %v3069_v39 = vpop.f32.mrb[7].mxu1 }
 0x540   :  { %3306 = vmatprep.subr.bf16.mxu0 %v3889_v21 }
 0x60d   :  { %v718_v40 = vpop.f32.mrb[6].mxu0 }
 0x60e   :  { %731 = vrot.lane.b32.xlu1 %v718_v40, %s3891_s15  ;;  %v4205_v41 = vpop.f32.mrb[7].mxu0 }
 0x611   :  { %v4207_v42 = vpop.f32.mrb[8].mxu0 }
 0x612   :  { %834 = vrot.lane.b32.xlu1 %v829_v38, %s3891_s15  ;;  %v4210_v43 = vpop.f32.mrb[9].mxu0 }
 0x616   :  { %857 = vrot.lane.b32.xlu1 %v2866_v44, %s3892_s18 }
 0x680   :  { %v732_v46 = vpop.permute.xlu1 %731 }
 0x681   :  { %v737_v47 = vadd.f32 %v732_v46, %v4125_v28  ;;  %v738_v48 = vadd.f32 %v732_v46, %v4128_v31 }
 0x683   :  { %v4221_v49 = vadd.f32 %v4216_v45, %v737_v47  ;;  %v4228_v62 = vadd.f32 %v4216_v45, %v738_v48 }
 0x684   :  { %v835_v50 = vpop.permute.xlu1 %834 }
 0x685   :  { %v837_v51 = vadd.f32 %v835_v50, %v4221_v49  ;;  %v838_v63 = vadd.f32 %v835_v50, %v4228_v62 }
 0x687   :  { %3428 = vtanh.f32 %v837_v51  ;;  %v2864_v53 = vmul.f32 -1.442695, %v837_v51  ;;  %v2865_v1 = vmul.f32 -1.442695, %v838_v63 }
 0x688   :  { %v858_v31 = vpop.permute.xlu1 %857 }
 0x689   :  { %3430 = vpow2.f32 %v2864_v53 }
 0x691   :  { %v3429_v52 = vpop.eup %3428 }
 0x692   :  { %862 = vrot.lane.b32.xlu0 %v3429_v52, %s3892_s18 }
 0x693   :  { %v3431_v54 = vpop.eup %3430 }
 0x694   :  { %v845_v55 = vadd.f32 1.0, %v3431_v54 }
 0x696   :  { %3432 = vrcp.f32 %v845_v55 }
 0x6a0   :  { %v3433_v56 = vpop.eup %3432 }
 0x6a1   :  { %v860_v58 = vmul.f32 %v3433_v56, %v858_v31 }
 0x704   :  { %v863_v57 = vpop.permute.xlu0 %862 }
 0x705   :  { %v865_v28 = vmul.f32 %v3433_v56, %v863_v57 }
 0x707   :  { %867 = vrot.lane.b32.xlu0 %v865_v28, %s3891_s15 }
 0x779   :  { %v868_v59 = vpop.permute.xlu0 %867 }
 0x77a   :  { %v870_v60 = vadd.f32 %v868_v59, %v860_v58 }
 0x77c   :  { %3434 = vtanh.f32 %v870_v60  ;;  %v973_v19 = vrot.slane %v870_v60, 7 }
 0x77d   :  { %3436 = vpow2.f32 %v2865_v1 }
 0x786   :  { %v3435_v61 = vpop.eup %3434 }
 0x787   :  { %873 = vrot.lane.b32.xlu1 %v3435_v61, %s3892_s18  ;;  %v3437_v2 = vpop.eup %3436 }
 0x788   :  { %v846_v3 = vadd.f32 1.0, %v3437_v2 }
 0x78a   :  { %3438 = vrcp.f32 %v846_v3 }
 0x794   :  { %v3439_v4 = vpop.eup %3438 }
 0x7f9   :  { %v874_v5 = vpop.permute.xlu1 %873 }
 0x7fa   :  { %v876_v6 = vmul.f32 %v3439_v4, %v874_v5 }
 0x7fc   :  { %878 = vst.msk [vmem:[#allocation2] sm:$0x1] %vm877_vm4, %v876_v6  ;;  %3079 = vmatmul.mubr.msk.f32.vlgmr.msra.gmra.mrb[10].mxu0 %vm162_vm0, %v876_v6 }
 0x7fd   :  { %3308 = vmatpush3.bf16.msra.mxu0 %v4155_v23  ;;  %3100 = vmatprep.mubr.msk.f32.mxu0 %vm3890_vm3, %v3887_v0 }
 0x7fe   :  { %3309 = vmatprep.subr.bf16.mxu0 %v3889_v21 }
 0x801   :  { %3311 = vmatpush3.bf16.msra.mxu0 %v4165_v26 }
 0x802   :  { %3318 = vmatprep.subr.bf16.mxu0 %v3889_v21 }
 0x8cf   :  { %v948_v7 = vpop.f32.mrb[10].mxu0 }
 0x8d0   :  { %v953_v8 = vrot.slane %v948_v7, 7  ;;  %v3080_v9 = vpop.f32.mrb[11].mxu0 }
 0x8d2   :  { %954 = vrot.lane.b32.xlu0 %v953_v8, %s3891_s15 }
 0x944   :  { %v955_v10 = vpop.permute.xlu0 %954 }
 0x945   :  { %v957_v11 = vadd.f32 %v955_v10, %v4221_v49  ;;  %v958_v27 = vadd.f32 %v955_v10, %v4228_v62 }
 0x947   :  { %3440 = vtanh.f32 %v957_v11  ;;  %v2868_v13 = vmul.f32 -1.442695, %v957_v11  ;;  %v2869_v29 = vmul.f32 -1.442695, %v958_v27 }
 0x949   :  { %3442 = vpow2.f32 %v2868_v13 }
 0x951   :  { %v3441_v12 = vpop.eup %3440 }
 0x952   :  { %977 = vrot.lane.b32.xlu1 %v3441_v12, %s3892_s18 }
 0x953   :  { %v3443_v14 = vpop.eup %3442 }
 0x954   :  { %v965_v15 = vadd.f32 1.0, %v3443_v14 }
 0x956   :  { %3444 = vrcp.f32 %v965_v15 }
 0x960   :  { %v3445_v16 = vpop.eup %3444 }
 0x961   :  { %v975_v20 = vmul.f32 %v3445_v16, %v973_v19 }
 0x9c4   :  { %v978_v17 = vpop.permute.xlu1 %977 }
 0x9c5   :  { %v980_v18 = vmul.f32 %v3445_v16, %v978_v17 }
 0x9c7   :  { %982 = vrot.lane.b32.xlu0 %v980_v18, %s3891_s15 }
 0xa39   :  { %v983_v22 = vpop.permute.xlu0 %982 }
 0xa3a   :  { %v985_v24 = vadd.f32 %v983_v22, %v975_v20 }
 0xa3c   :  { %3446 = vtanh.f32 %v985_v24  ;;  %v1089_v28 = vrot.slane %v985_v24, 7 }
 0xa3d   :  { %3448 = vpow2.f32 %v2869_v29 }
 0xa46   :  { %v3447_v25 = vpop.eup %3446 }
 0xa47   :  { %988 = vrot.lane.b32.xlu1 %v3447_v25, %s3892_s18  ;;  %v3449_v30 = vpop.eup %3448 }
 0xa48   :  { %v966_v32 = vadd.f32 1.0, %v3449_v30 }
 0xa4a   :  { %3450 = vrcp.f32 %v966_v32 }
 0xa54   :  { %v3451_v33 = vpop.eup %3450 }
 0xab9   :  { %v989_v38 = vpop.permute.xlu1 %988 }
 0xaba   :  { %v991_v39 = vmul.f32 %v3451_v33, %v989_v38 }
 0xabc   :  { %993 = vst.msk [vmem:[#allocation2] sm:$0x2] %vm992_vm5, %v991_v39  ;;  %v995_v40 = vrot.slane %v991_v39, 1 }
 0xabe   :  { %3090 = vmatmul.mubr.msk.f32.vlgmr.msra.gmra.mrb[8].mxu1 %vm162_vm0, %v995_v40 }
 0xabf   :  { %3314 = vmatpush3.bf16.msra.mxu1 %v4155_v23  ;;  %3111 = vmatprep.mubr.msk.f32.mxu1 %vm3890_vm3, %v3887_v0 }
 0xac0   :  { %3315 = vmatprep.subr.bf16.mxu1 %v3889_v21 }
 0xac3   :  { %3317 = vmatpush3.bf16.msra.mxu1 %v4165_v26 }
 0xac4   :  { %3324 = vmatprep.subr.bf16.mxu1 %v3889_v21 }
 0xb91   :  { %v1064_v44 = vpop.f32.mrb[8].mxu1 }
 0xb92   :  { %v1069_v46 = vrot.slane %v1064_v44, 6  ;;  %v3091_v47 = vpop.f32.mrb[9].mxu1 }
 0xb94   :  { %1070 = vrot.lane.b32.xlu0 %v1069_v46, %s3891_s15 }
 0xc06   :  { %v1071_v48 = vpop.permute.xlu0 %1070 }
 0xc07   :  { %v1073_v50 = vadd.f32 %v1071_v48, %v4221_v49  ;;  %v1074_v61 = vadd.f32 %v1071_v48, %v4228_v62 }
 0xc09   :  { %3452 = vtanh.f32 %v1073_v50  ;;  %v2871_v52 = vmul.f32 -1.442695, %v1073_v50  ;;  %v2872_v63 = vmul.f32 -1.442695, %v1074_v61 }
 0xc0b   :  { %3454 = vpow2.f32 %v2871_v52 }
 0xc13   :  { %v3453_v51 = vpop.eup %3452 }
 0xc14   :  { %1093 = vrot.lane.b32.xlu1 %v3453_v51, %s3892_s18 }
 0xc15   :  { %v3455_v53 = vpop.eup %3454 }
 0xc16   :  { %v1081_v54 = vadd.f32 1.0, %v3455_v53 }
 0xc18   :  { %3456 = vrcp.f32 %v1081_v54 }
 0xc22   :  { %v3457_v55 = vpop.eup %3456 }
 0xc23   :  { %v1091_v31 = vmul.f32 %v3457_v55, %v1089_v28 }
 0xc86   :  { %v1094_v56 = vpop.permute.xlu1 %1093 }
 0xc87   :  { %v1096_v57 = vmul.f32 %v3457_v55, %v1094_v56 }
 0xc89   :  { %1098 = vrot.lane.b32.xlu0 %v1096_v57, %s3891_s15 }
 0xcfb   :  { %v1099_v58 = vpop.permute.xlu0 %1098 }
 0xcfc   :  { %v1101_v59 = vadd.f32 %v1099_v58, %v1091_v31 }
 0xcfe   :  { %3458 = vtanh.f32 %v1101_v59  ;;  %v1205_v19 = vrot.slane %v1101_v59, 7 }
 0xcff   :  { %3460 = vpow2.f32 %v2872_v63 }
 0xd08   :  { %v3459_v60 = vpop.eup %3458 }
 0xd09   :  { %1104 = vrot.lane.b32.xlu1 %v3459_v60, %s3892_s18  ;;  %v3461_v1 = vpop.eup %3460 }
 0xd0a   :  { %v1082_v2 = vadd.f32 1.0, %v3461_v1 }
 0xd0c   :  { %3462 = vrcp.f32 %v1082_v2 }
 0xd16   :  { %v3463_v3 = vpop.eup %3462 }
 0xd7b   :  { %v1105_v4 = vpop.permute.xlu1 %1104 }
 0xd7c   :  { %v1107_v5 = vmul.f32 %v3463_v3, %v1105_v4 }
 0xd7e   :  { %1109 = vst.msk [vmem:[#allocation2] sm:$0x4] %vm1108_vm6, %v1107_v5  ;;  %v1111_v6 = vrot.slane %v1107_v5, 2 }
 0xd80   :  { %3101 = vmatmul.mubr.msk.f32.vlgmr.msra.gmra.mrb[12].mxu0 %vm162_vm0, %v1111_v6 }
 0xd81   :  { %3320 = vmatpush3.bf16.msra.mxu0 %v4155_v23  ;;  %3122 = vmatprep.mubr.msk.f32.mxu0 %vm3890_vm3, %v3887_v0 }
 0xd82   :  { %3321 = vmatprep.subr.bf16.mxu0 %v3889_v21 }
 0xd85   :  { %3323 = vmatpush3.bf16.msra.mxu0 %v4165_v26 }
 0xd86   :  { %3330 = vmatprep.subr.bf16.mxu0 %v3889_v21 }
 0xe53   :  { %v1180_v7 = vpop.f32.mrb[12].mxu0 }
 0xe54   :  { %v1185_v8 = vrot.slane %v1180_v7, 5  ;;  %v3102_v9 = vpop.f32.mrb[13].mxu0 }
 0xe56   :  { %1186 = vrot.lane.b32.xlu0 %v1185_v8, %s3891_s15 }
 0xec8   :  { %v1187_v10 = vpop.permute.xlu0 %1186 }
 0xec9   :  { %v1189_v11 = vadd.f32 %v1187_v10, %v4221_v49  ;;  %v1190_v27 = vadd.f32 %v1187_v10, %v4228_v62 }
 0xecb   :  { %3464 = vtanh.f32 %v1189_v11  ;;  %v2874_v13 = vmul.f32 -1.442695, %v1189_v11  ;;  %v2875_v29 = vmul.f32 -1.442695, %v1190_v27 }
 0xecd   :  { %3466 = vpow2.f32 %v2874_v13 }
 0xed5   :  { %v3465_v12 = vpop.eup %3464 }
 0xed6   :  { %1209 = vrot.lane.b32.xlu1 %v3465_v12, %s3892_s18 }
 0xed7   :  { %v3467_v14 = vpop.eup %3466 }
 0xed8   :  { %v1197_v15 = vadd.f32 1.0, %v3467_v14 }
 0xeda   :  { %3468 = vrcp.f32 %v1197_v15 }
 0xee4   :  { %v3469_v16 = vpop.eup %3468 }
 0xee5   :  { %v1207_v20 = vmul.f32 %v3469_v16, %v1205_v19 }
 0xf48   :  { %v1210_v17 = vpop.permute.xlu1 %1209 }
 0xf49   :  { %v1212_v18 = vmul.f32 %v3469_v16, %v1210_v17 }
 0xf4b   :  { %1214 = vrot.lane.b32.xlu0 %v1212_v18, %s3891_s15 }
 0xfbd   :  { %v1215_v22 = vpop.permute.xlu0 %1214 }
 0xfbe   :  { %v1217_v24 = vadd.f32 %v1215_v22, %v1207_v20 }
 0xfc0   :  { %3470 = vtanh.f32 %v1217_v24  ;;  %v1321_v28 = vrot.slane %v1217_v24, 7 }
 0xfc1   :  { %3472 = vpow2.f32 %v2875_v29 }
 0xfca   :  { %v3471_v25 = vpop.eup %3470 }
 0xfcb   :  { %1220 = vrot.lane.b32.xlu1 %v3471_v25, %s3892_s18  ;;  %v3473_v30 = vpop.eup %3472 }
 0xfcc   :  { %v1198_v32 = vadd.f32 1.0, %v3473_v30 }
 0xfce   :  { %3474 = vrcp.f32 %v1198_v32 }
 0xfd8   :  { %v3475_v33 = vpop.eup %3474 }
0x103d   :  { %v1221_v38 = vpop.permute.xlu1 %1220 }
0x103e   :  { %v1223_v39 = vmul.f32 %v3475_v33, %v1221_v38 }
0x1040   :  { %1225 = vst.msk [vmem:[#allocation2] sm:$0x8] %vm1224_vm7, %v1223_v39  ;;  %v1227_v40 = vrot.slane %v1223_v39, 3 }
0x1042   :  { %3112 = vmatmul.mubr.msk.f32.vlgmr.msra.gmra.mrb[10].mxu1 %vm162_vm0, %v1227_v40 }
0x1043   :  { %3326 = vmatpush3.bf16.msra.mxu1 %v4155_v23  ;;  %3133 = vmatprep.mubr.msk.f32.mxu1 %vm3890_vm3, %v3887_v0 }
0x1044   :  { %3327 = vmatprep.subr.bf16.mxu1 %v3889_v21 }
0x1047   :  { %3329 = vmatpush3.bf16.msra.mxu1 %v4165_v26 }
0x1048   :  { %3336 = vmatprep.subr.bf16.mxu1 %v3889_v21 }
0x1115   :  { %v1296_v44 = vpop.f32.mrb[10].mxu1 }
0x1116   :  { %v1301_v46 = vrot.slane %v1296_v44, 4  ;;  %v3113_v47 = vpop.f32.mrb[11].mxu1 }
0x1118   :  { %1302 = vrot.lane.b32.xlu0 %v1301_v46, %s3891_s15 }
0x118a   :  { %v1303_v48 = vpop.permute.xlu0 %1302 }
0x118b   :  { %v1305_v50 = vadd.f32 %v1303_v48, %v4221_v49  ;;  %v1306_v61 = vadd.f32 %v1303_v48, %v4228_v62 }
0x118d   :  { %3476 = vtanh.f32 %v1305_v50  ;;  %v2877_v52 = vmul.f32 -1.442695, %v1305_v50  ;;  %v2878_v63 = vmul.f32 -1.442695, %v1306_v61 }
0x118f   :  { %3478 = vpow2.f32 %v2877_v52 }
0x1197   :  { %v3477_v51 = vpop.eup %3476 }
0x1198   :  { %1325 = vrot.lane.b32.xlu1 %v3477_v51, %s3892_s18 }
0x1199   :  { %v3479_v53 = vpop.eup %3478 }
0x119a   :  { %v1313_v54 = vadd.f32 1.0, %v3479_v53 }
0x119c   :  { %3480 = vrcp.f32 %v1313_v54 }
0x11a6   :  { %v3481_v55 = vpop.eup %3480 }
0x11a7   :  { %v1323_v31 = vmul.f32 %v3481_v55, %v1321_v28 }
0x120a   :  { %v1326_v56 = vpop.permute.xlu1 %1325 }
0x120b   :  { %v1328_v57 = vmul.f32 %v3481_v55, %v1326_v56 }
0x120d   :  { %1330 = vrot.lane.b32.xlu0 %v1328_v57, %s3891_s15 }
0x127f   :  { %v1331_v58 = vpop.permute.xlu0 %1330 }
0x1280   :  { %v1333_v59 = vadd.f32 %v1331_v58, %v1323_v31 }
0x1282   :  { %3482 = vtanh.f32 %v1333_v59  ;;  %v1437_v19 = vrot.slane %v1333_v59, 7 }
0x1283   :  { %3484 = vpow2.f32 %v2878_v63 }
0x128c   :  { %v3483_v60 = vpop.eup %3482 }
0x128d   :  { %1336 = vrot.lane.b32.xlu1 %v3483_v60, %s3892_s18  ;;  %v3485_v1 = vpop.eup %3484 }
0x128e   :  { %v1314_v2 = vadd.f32 1.0, %v3485_v1 }
0x1290   :  { %3486 = vrcp.f32 %v1314_v2 }
0x129a   :  { %v3487_v3 = vpop.eup %3486 }
0x12ff   :  { %v1337_v4 = vpop.permute.xlu1 %1336 }
0x1300   :  { %v1339_v5 = vmul.f32 %v3487_v3, %v1337_v4 }
0x1302   :  { %1341 = vst.msk [vmem:[#allocation2] sm:$0x10] %vm1340_vm8, %v1339_v5  ;;  %v1343_v6 = vrot.slane %v1339_v5, 4 }
0x1304   :  { %3123 = vmatmul.mubr.msk.f32.vlgmr.msra.gmra.mrb[14].mxu0 %vm162_vm0, %v1343_v6 }
0x1305   :  { %3332 = vmatpush3.bf16.msra.mxu0 %v4155_v23  ;;  %3144 = vmatprep.mubr.msk.f32.mxu0 %vm3890_vm3, %v3887_v0 }
0x1306   :  { %3333 = vmatprep.subr.bf16.mxu0 %v3889_v21 }
0x1309   :  { %3335 = vmatpush3.bf16.msra.mxu0 %v4165_v26 }
0x130a   :  { %3342 = vmatprep.subr.bf16.mxu0 %v3889_v21 }
0x13d7   :  { %v1412_v7 = vpop.f32.mrb[14].mxu0 }
0x13d8   :  { %v1417_v8 = vrot.slane %v1412_v7, 3  ;;  %v3124_v9 = vpop.f32.mrb[15].mxu0 }
0x13da   :  { %1418 = vrot.lane.b32.xlu0 %v1417_v8, %s3891_s15 }
0x144c   :  { %v1419_v10 = vpop.permute.xlu0 %1418 }
0x144d   :  { %v1421_v11 = vadd.f32 %v1419_v10, %v4221_v49  ;;  %v1422_v27 = vadd.f32 %v1419_v10, %v4228_v62 }
0x144f   :  { %3488 = vtanh.f32 %v1421_v11  ;;  %v2880_v13 = vmul.f32 -1.442695, %v1421_v11  ;;  %v2881_v29 = vmul.f32 -1.442695, %v1422_v27 }
0x1451   :  { %3490 = vpow2.f32 %v2880_v13 }
0x1459   :  { %v3489_v12 = vpop.eup %3488 }
0x145a   :  { %1441 = vrot.lane.b32.xlu1 %v3489_v12, %s3892_s18 }
0x145b   :  { %v3491_v14 = vpop.eup %3490 }
0x145c   :  { %v1429_v15 = vadd.f32 1.0, %v3491_v14 }
0x145e   :  { %3492 = vrcp.f32 %v1429_v15 }
0x1468   :  { %v3493_v16 = vpop.eup %3492 }
0x1469   :  { %v1439_v20 = vmul.f32 %v3493_v16, %v1437_v19 }
0x14cc   :  { %v1442_v17 = vpop.permute.xlu1 %1441 }
0x14cd   :  { %v1444_v18 = vmul.f32 %v3493_v16, %v1442_v17 }
0x14cf   :  { %1446 = vrot.lane.b32.xlu0 %v1444_v18, %s3891_s15 }
0x1541   :  { %v1447_v22 = vpop.permute.xlu0 %1446 }
0x1542   :  { %v1449_v24 = vadd.f32 %v1447_v22, %v1439_v20 }
0x1544   :  { %3494 = vtanh.f32 %v1449_v24  ;;  %v1553_v28 = vrot.slane %v1449_v24, 7 }
0x1545   :  { %3496 = vpow2.f32 %v2881_v29 }
0x154e   :  { %v3495_v25 = vpop.eup %3494 }
0x154f   :  { %1452 = vrot.lane.b32.xlu1 %v3495_v25, %s3892_s18  ;;  %v3497_v30 = vpop.eup %3496 }
0x1550   :  { %v1430_v32 = vadd.f32 1.0, %v3497_v30 }
0x1552   :  { %3498 = vrcp.f32 %v1430_v32 }
0x155c   :  { %v3499_v33 = vpop.eup %3498 }
0x15c1   :  { %v1453_v38 = vpop.permute.xlu1 %1452 }
0x15c2   :  { %v1455_v39 = vmul.f32 %v3499_v33, %v1453_v38 }
0x15c4   :  { %1457 = vst.msk [vmem:[#allocation2] sm:$0x20] %vm1456_vm9, %v1455_v39  ;;  %v1459_v40 = vrot.slane %v1455_v39, 5 }
0x15c6   :  { %3134 = vmatmul.mubr.msk.f32.vlgmr.msra.gmra.mrb[12].mxu1 %vm162_vm0, %v1459_v40 }
0x15c7   :  { %3338 = vmatpush3.bf16.msra.mxu1 %v4155_v23  ;;  %3155 = vmatprep.mubr.msk.f32.mxu1 %vm3890_vm3, %v3887_v0 }
0x15c8   :  { %3339 = vmatprep.subr.bf16.mxu1 %v3889_v21 }
0x15cb   :  { %3341 = vmatpush3.bf16.msra.mxu1 %v4165_v26 }
0x15cc   :  { %3348 = vmatprep.subr.bf16.mxu1 %v3889_v21 }
0x1699   :  { %v1528_v44 = vpop.f32.mrb[12].mxu1 }
0x169a   :  { %v1533_v46 = vrot.slane %v1528_v44, 2  ;;  %v3135_v47 = vpop.f32.mrb[13].mxu1 }
0x169c   :  { %1534 = vrot.lane.b32.xlu0 %v1533_v46, %s3891_s15 }
0x170e   :  { %v1535_v48 = vpop.permute.xlu0 %1534 }
0x170f   :  { %v1537_v50 = vadd.f32 %v1535_v48, %v4221_v49  ;;  %v1538_v61 = vadd.f32 %v1535_v48, %v4228_v62 }
0x1711   :  { %3500 = vtanh.f32 %v1537_v50  ;;  %v2883_v52 = vmul.f32 -1.442695, %v1537_v50  ;;  %v2884_v63 = vmul.f32 -1.442695, %v1538_v61 }
0x1713   :  { %3502 = vpow2.f32 %v2883_v52 }
0x171b   :  { %v3501_v51 = vpop.eup %3500 }
0x171c   :  { %1557 = vrot.lane.b32.xlu1 %v3501_v51, %s3892_s18 }
0x171d   :  { %v3503_v53 = vpop.eup %3502 }
0x171e   :  { %v1545_v54 = vadd.f32 1.0, %v3503_v53 }
0x1720   :  { %3504 = vrcp.f32 %v1545_v54 }
0x172a   :  { %v3505_v55 = vpop.eup %3504 }
0x172b   :  { %v1555_v31 = vmul.f32 %v3505_v55, %v1553_v28 }
0x178e   :  { %v1558_v56 = vpop.permute.xlu1 %1557 }
0x178f   :  { %v1560_v57 = vmul.f32 %v3505_v55, %v1558_v56 }
0x1791   :  { %1562 = vrot.lane.b32.xlu0 %v1560_v57, %s3891_s15 }
0x1803   :  { %v1563_v58 = vpop.permute.xlu0 %1562 }
0x1804   :  { %v1565_v59 = vadd.f32 %v1563_v58, %v1555_v31 }
0x1806   :  { %3506 = vtanh.f32 %v1565_v59  ;;  %v1669_v19 = vrot.slane %v1565_v59, 7 }
0x1807   :  { %3508 = vpow2.f32 %v2884_v63 }
0x1810   :  { %v3507_v60 = vpop.eup %3506 }
0x1811   :  { %1568 = vrot.lane.b32.xlu1 %v3507_v60, %s3892_s18  ;;  %v3509_v1 = vpop.eup %3508 }
0x1812   :  { %v1546_v2 = vadd.f32 1.0, %v3509_v1 }
0x1814   :  { %3510 = vrcp.f32 %v1546_v2 }
0x181e   :  { %v3511_v3 = vpop.eup %3510 }
0x1883   :  { %v1569_v4 = vpop.permute.xlu1 %1568 }
0x1884   :  { %v1571_v5 = vmul.f32 %v3511_v3, %v1569_v4 }
0x1886   :  { %1573 = vst.msk [vmem:[#allocation2] sm:$0x40] %vm1572_vm10, %v1571_v5  ;;  %v1575_v6 = vrot.slane %v1571_v5, 6 }
0x1888   :  { %3145 = vmatmul.mubr.msk.f32.vlgmr.msra.gmra.mrb[16].mxu0 %vm162_vm0, %v1575_v6 }
0x1889   :  { %3344 = vmatpush3.bf16.msra.mxu0 %v4155_v23  ;;  %3166 = vmatprep.mubr.msk.f32.mxu0 %vm3890_vm3, %v3887_v0 }
0x188a   :  { %3345 = vmatprep.subr.bf16.mxu0 %v3889_v21 }
0x188d   :  { %3347 = vmatpush3.bf16.msra.mxu0 %v4165_v26 }
0x188e   :  { %3354 = vmatprep.subr.bf16.mxu0 %v3889_v21 }
0x195b   :  { %v1644_v7 = vpop.f32.mrb[16].mxu0 }
0x195c   :  { %v1649_v8 = vrot.slane %v1644_v7, 1  ;;  %v3146_v9 = vpop.f32.mrb[17].mxu0 }
0x195e   :  { %1650 = vrot.lane.b32.xlu0 %v1649_v8, %s3891_s15 }
0x19d0   :  { %v1651_v10 = vpop.permute.xlu0 %1650 }
0x19d1   :  { %v1653_v11 = vadd.f32 %v1651_v10, %v4221_v49  ;;  %v1654_v25 = vadd.f32 %v1651_v10, %v4228_v62 }
0x19d3   :  { %3512 = vtanh.f32 %v1653_v11  ;;  %v2886_v13 = vmul.f32 -1.442695, %v1653_v11  ;;  %v2887_v27 = vmul.f32 -1.442695, %v1654_v25 }
0x19d5   :  { %3514 = vpow2.f32 %v2886_v13 }
0x19dd   :  { %v3513_v12 = vpop.eup %3512 }
0x19de   :  { %1673 = vrot.lane.b32.xlu1 %v3513_v12, %s3892_s18 }
0x19df   :  { %v3515_v14 = vpop.eup %3514 }
0x19e0   :  { %v1661_v15 = vadd.f32 1.0, %v3515_v14 }
0x19e2   :  { %3516 = vrcp.f32 %v1661_v15 }
0x19ec   :  { %v3517_v16 = vpop.eup %3516 }
0x19ed   :  { %v1671_v20 = vmul.f32 %v3517_v16, %v1669_v19 }
0x1a50   :  { %v1674_v17 = vpop.permute.xlu1 %1673 }
0x1a51   :  { %v1676_v18 = vmul.f32 %v3517_v16, %v1674_v17 }
0x1a53   :  { %1678 = vrot.lane.b32.xlu0 %v1676_v18, %s3891_s15 }
0x1a57   :  { %733 = vrot.lane.b32.xlu0 %v4207_v42, %s3891_s15 }
0x1ac5   :  { %v1679_v49 = vpop.permute.xlu0 %1678 }
0x1ac6   :  { %v1681_v22 = vadd.f32 %v1679_v49, %v1671_v20 }
0x1ac8   :  { %3518 = vtanh.f32 %v1681_v22 }
0x1ac9   :  { %3520 = vpow2.f32 %v2887_v27  ;;  %v734_v40 = vpop.permute.xlu0 %733 }
0x1aca   :  { %v739_v44 = vadd.f32 %v734_v40, %v4132_v35  ;;  %v1784_v35 = vrot.slane %v1681_v22, 7  ;;  %v740_v59 = vadd.f32 %v734_v40, %v4135_v37 }
0x1acc   :  { %v4342_v46 = vadd.f32 %v4216_v45, %v739_v44  ;;  %v4350_v60 = vadd.f32 %v4216_v45, %v740_v59 }
0x1ad2   :  { %v3519_v24 = vpop.eup %3518 }
0x1ad3   :  { %1684 = vrot.lane.b32.xlu1 %v3519_v24, %s3892_s18  ;;  %v3521_v29 = vpop.eup %3520 }
0x1ad4   :  { %v1662_v30 = vadd.f32 1.0, %v3521_v29 }
0x1ad6   :  { %3522 = vrcp.f32 %v1662_v30 }
0x1ae0   :  { %v3523_v32 = vpop.eup %3522 }
0x1b45   :  { %v1685_v33 = vpop.permute.xlu1 %1684 }
0x1b46   :  { %v1687_v38 = vmul.f32 %v3523_v32, %v1685_v33 }
0x1b48   :  { %1689 = vst.msk [vmem:[#allocation2] sm:$0x80] %vm1688_vm11, %v1687_v38  ;;  %v1691_v42 = vrot.slane %v1687_v38, 7 }
0x1b4a   :  { %3156 = vmatmul.mubr.msk.f32.vlgmr.msra.gmra.mrb[14].mxu1 %vm162_vm0, %v1691_v42 }
0x1b4b   :  { %3350 = vmatpush3.bf16.msra.mxu1 %v4155_v23  ;;  %3177 = vmatprep.mubr.msk.f32.mxu1 %vm3890_vm3, %v3887_v0 }
0x1b4c   :  { %3351 = vmatprep.subr.bf16.mxu1 %v3889_v21 }
0x1b4f   :  { %3353 = vmatpush3.bf16.msra.mxu1 %v4165_v26 }
0x1b50   :  { %3360 = vmatprep.subr.bf16.mxu1 %v3889_v21 }
0x1c1d   :  { %v1760_v62 = vpop.f32.mrb[14].mxu1 }
0x1c1e   :  { %1765 = vrot.lane.b32.xlu1 %v1760_v62, %s3891_s15  ;;  %v3157_v39 = vpop.f32.mrb[15].mxu1 }
0x1c90   :  { %v1766_v47 = vpop.permute.xlu1 %1765 }
0x1c91   :  { %v1768_v48 = vadd.f32 %v1766_v47, %v4342_v46  ;;  %v1769_v61 = vadd.f32 %v1766_v47, %v4350_v60 }
0x1c93   :  { %3524 = vtanh.f32 %v1768_v48  ;;  %v2889_v51 = vmul.f32 -1.442695, %v1768_v48  ;;  %v2890_v63 = vmul.f32 -1.442695, %v1769_v61 }
0x1c95   :  { %3526 = vpow2.f32 %v2889_v51 }
0x1c9d   :  { %v3525_v50 = vpop.eup %3524 }
0x1c9e   :  { %1788 = vrot.lane.b32.xlu0 %v3525_v50, %s3892_s18 }
0x1c9f   :  { %v3527_v52 = vpop.eup %3526 }
0x1ca0   :  { %v1776_v53 = vadd.f32 1.0, %v3527_v52 }
0x1ca2   :  { %3528 = vrcp.f32 %v1776_v53 }
0x1cac   :  { %v3529_v54 = vpop.eup %3528 }
0x1cad   :  { %v1786_v57 = vmul.f32 %v3529_v54, %v1784_v35 }
0x1d10   :  { %v1789_v55 = vpop.permute.xlu0 %1788 }
0x1d11   :  { %v1791_v56 = vmul.f32 %v3529_v54, %v1789_v55 }
0x1d13   :  { %1793 = vrot.lane.b32.xlu1 %v1791_v56, %s3891_s15 }
0x1d85   :  { %v1794_v28 = vpop.permute.xlu1 %1793 }
0x1d86   :  { %v1796_v31 = vadd.f32 %v1794_v28, %v1786_v57 }
0x1d88   :  { %3530 = vtanh.f32 %v1796_v31  ;;  %v1898_v16 = vrot.slane %v1796_v31, 7 }
0x1d89   :  { %3532 = vpow2.f32 %v2890_v63 }
0x1d92   :  { %v3531_v58 = vpop.eup %3530 }
0x1d93   :  { %1799 = vrot.lane.b32.xlu0 %v3531_v58, %s3892_s18  ;;  %v3533_v1 = vpop.eup %3532 }
0x1d94   :  { %v1777_v2 = vadd.f32 1.0, %v3533_v1 }
0x1d96   :  { %3534 = vrcp.f32 %v1777_v2 }
0x1da0   :  { %v3535_v3 = vpop.eup %3534 }
0x1e05   :  { %v1800_v4 = vpop.permute.xlu0 %1799 }
0x1e06   :  { %v1802_v5 = vmul.f32 %v3535_v3, %v1800_v4 }
0x1e08   :  { %1803 = vst.msk [vmem:[#allocation2 + $0x8] sm:$0x1] %vm877_vm4, %v1802_v5  ;;  %3167 = vmatmul.mubr.msk.f32.vlgmr.msra.gmra.mrb[18].mxu0 %vm162_vm0, %v1802_v5 }
0x1e09   :  { %3356 = vmatpush3.bf16.msra.mxu0 %v4155_v23  ;;  %3188 = vmatprep.mubr.msk.f32.mxu0 %vm3890_vm3, %v3887_v0 }
0x1e0a   :  { %3357 = vmatprep.subr.bf16.mxu0 %v3889_v21 }
0x1e0d   :  { %3359 = vmatpush3.bf16.msra.mxu0 %v4165_v26 }
0x1e0e   :  { %3366 = vmatprep.subr.bf16.mxu0 %v3889_v21 }
0x1edb   :  { %v1873_v37 = vpop.f32.mrb[18].mxu0 }
0x1edc   :  { %v1878_v45 = vrot.slane %v1873_v37, 7  ;;  %v3168_v6 = vpop.f32.mrb[19].mxu0 }
0x1ede   :  { %1879 = vrot.lane.b32.xlu1 %v1878_v45, %s3891_s15 }
0x1f50   :  { %v1880_v7 = vpop.permute.xlu1 %1879 }
0x1f51   :  { %v1882_v8 = vadd.f32 %v1880_v7, %v4342_v46  ;;  %v1883_v49 = vadd.f32 %v1880_v7, %v4350_v60 }
0x1f53   :  { %3536 = vtanh.f32 %v1882_v8  ;;  %v2892_v10 = vmul.f32 -1.442695, %v1882_v8  ;;  %v2893_v22 = vmul.f32 -1.442695, %v1883_v49 }
0x1f55   :  { %3538 = vpow2.f32 %v2892_v10 }
0x1f5d   :  { %v3537_v9 = vpop.eup %3536 }
0x1f5e   :  { %1902 = vrot.lane.b32.xlu0 %v3537_v9, %s3892_s18 }
0x1f5f   :  { %v3539_v11 = vpop.eup %3538 }
0x1f60   :  { %v1890_v12 = vadd.f32 1.0, %v3539_v11 }
0x1f62   :  { %3540 = vrcp.f32 %v1890_v12 }
0x1f6c   :  { %v3541_v13 = vpop.eup %3540 }
0x1f6d   :  { %v1900_v17 = vmul.f32 %v3541_v13, %v1898_v16 }
0x1fd0   :  { %v1903_v14 = vpop.permute.xlu0 %1902 }
0x1fd1   :  { %v1905_v15 = vmul.f32 %v3541_v13, %v1903_v14 }
0x1fd3   :  { %1907 = vrot.lane.b32.xlu1 %v1905_v15, %s3891_s15 }
0x2045   :  { %v1908_v18 = vpop.permute.xlu1 %1907 }
0x2046   :  { %v1910_v19 = vadd.f32 %v1908_v18, %v1900_v17 }
0x2048   :  { %3542 = vtanh.f32 %v1910_v19  ;;  %v2013_v53 = vrot.slane %v1910_v19, 7 }
0x2049   :  { %3544 = vpow2.f32 %v2893_v22 }
0x2052   :  { %v3543_v20 = vpop.eup %3542 }
0x2053   :  { %1913 = vrot.lane.b32.xlu0 %v3543_v20, %s3892_s18  ;;  %v3545_v24 = vpop.eup %3544 }
0x2054   :  { %v1891_v25 = vadd.f32 1.0, %v3545_v24 }
0x2056   :  { %3546 = vrcp.f32 %v1891_v25 }
0x2060   :  { %v3547_v27 = vpop.eup %3546 }
0x20c5   :  { %v1914_v29 = vpop.permute.xlu0 %1913 }
0x20c6   :  { %v1916_v30 = vmul.f32 %v3547_v27, %v1914_v29 }
0x20c8   :  { %1917 = vst.msk [vmem:[#allocation2 + $0x8] sm:$0x2] %vm992_vm5, %v1916_v30  ;;  %v1919_v32 = vrot.slane %v1916_v30, 1 }
0x20ca   :  { %3178 = vmatmul.mubr.msk.f32.vlgmr.msra.gmra.mrb[16].mxu1 %vm162_vm0, %v1919_v32 }
0x20cb   :  { %3362 = vmatpush3.bf16.msra.mxu1 %v4155_v23  ;;  %3199 = vmatprep.mubr.msk.f32.mxu1 %vm3890_vm3, %v3887_v0 }
0x20cc   :  { %3363 = vmatprep.subr.bf16.mxu1 %v3889_v21 }
0x20cf   :  { %3365 = vmatpush3.bf16.msra.mxu1 %v4165_v26 }
0x20d0   :  { %3372 = vmatprep.subr.bf16.mxu1 %v3889_v21 }
0x219d   :  { %v1988_v33 = vpop.f32.mrb[16].mxu1 }
0x219e   :  { %v1993_v38 = vrot.slane %v1988_v33, 6  ;;  %v3179_v42 = vpop.f32.mrb[17].mxu1 }
0x21a0   :  { %1994 = vrot.lane.b32.xlu1 %v1993_v38, %s3891_s15 }
0x2212   :  { %v1995_v62 = vpop.permute.xlu1 %1994 }
0x2213   :  { %v1997_v39 = vadd.f32 %v1995_v62, %v4342_v46  ;;  %v1998_v57 = vadd.f32 %v1995_v62, %v4350_v60 }
0x2215   :  { %3548 = vtanh.f32 %v1997_v39  ;;  %v2895_v44 = vmul.f32 -1.442695, %v1997_v39  ;;  %v2896_v28 = vmul.f32 -1.442695, %v1998_v57 }
0x2217   :  { %3550 = vpow2.f32 %v2895_v44 }
0x221f   :  { %v3549_v40 = vpop.eup %3548 }
0x2220   :  { %2017 = vrot.lane.b32.xlu0 %v3549_v40, %s3892_s18 }
0x2221   :  { %v3551_v47 = vpop.eup %3550 }
0x2222   :  { %v2005_v48 = vadd.f32 1.0, %v3551_v47 }
0x2224   :  { %3552 = vrcp.f32 %v2005_v48 }
0x222e   :  { %v3553_v50 = vpop.eup %3552 }
0x222f   :  { %v2015_v54 = vmul.f32 %v3553_v50, %v2013_v53 }
0x2292   :  { %v2018_v51 = vpop.permute.xlu0 %2017 }
0x2293   :  { %v2020_v52 = vmul.f32 %v3553_v50, %v2018_v51 }
0x2295   :  { %2022 = vrot.lane.b32.xlu1 %v2020_v52, %s3891_s15 }
0x2307   :  { %v2023_v55 = vpop.permute.xlu1 %2022 }
0x2308   :  { %v2025_v56 = vadd.f32 %v2023_v55, %v2015_v54 }
0x230a   :  { %3554 = vtanh.f32 %v2025_v56  ;;  %v2128_v12 = vrot.slane %v2025_v56, 7 }
0x230b   :  { %3556 = vpow2.f32 %v2896_v28 }
0x2314   :  { %v3555_v35 = vpop.eup %3554 }
0x2315   :  { %2028 = vrot.lane.b32.xlu0 %v3555_v35, %s3892_s18  ;;  %v3557_v31 = vpop.eup %3556 }
0x2316   :  { %v2006_v58 = vadd.f32 1.0, %v3557_v31 }
0x2318   :  { %3558 = vrcp.f32 %v2006_v58 }
0x2322   :  { %v3559_v59 = vpop.eup %3558 }
0x2387   :  { %v2029_v61 = vpop.permute.xlu0 %2028 }
0x2388   :  { %v2031_v63 = vmul.f32 %v3559_v59, %v2029_v61 }
0x238a   :  { %2032 = vst.msk [vmem:[#allocation2 + $0x8] sm:$0x4] %vm1108_vm6, %v2031_v63  ;;  %v2034_v1 = vrot.slane %v2031_v63, 2 }
0x238c   :  { %3189 = vmatmul.mubr.msk.f32.vlgmr.msra.gmra.mrb[20].mxu0 %vm162_vm0, %v2034_v1 }
0x238d   :  { %3368 = vmatpush3.bf16.msra.mxu0 %v4155_v23  ;;  %3210 = vmatprep.mubr.msk.f32.mxu0 %vm3890_vm3, %v3887_v0 }
0x238e   :  { %3369 = vmatprep.subr.bf16.mxu0 %v3889_v21 }
0x2391   :  { %3371 = vmatpush3.bf16.msra.mxu0 %v4165_v26 }
0x2392   :  { %3378 = vmatprep.subr.bf16.mxu0 %v3889_v21 }
0x245f   :  { %v2103_v2 = vpop.f32.mrb[20].mxu0 }
0x2460   :  { %v2108_v3 = vrot.slane %v2103_v2, 5  ;;  %v3190_v4 = vpop.f32.mrb[21].mxu0 }
0x2462   :  { %2109 = vrot.lane.b32.xlu1 %v2108_v3, %s3891_s15 }
0x24d4   :  { %v2110_v5 = vpop.permute.xlu1 %2109 }
0x24d5   :  { %v2112_v37 = vadd.f32 %v2110_v5, %v4342_v46  ;;  %v2113_v17 = vadd.f32 %v2110_v5, %v4350_v60 }
0x24d7   :  { %3560 = vtanh.f32 %v2112_v37  ;;  %v2898_v6 = vmul.f32 -1.442695, %v2112_v37  ;;  %v2899_v18 = vmul.f32 -1.442695, %v2113_v17  ;;  %v2614_v17 = vld [vmem:[#allocation2] sm:$0xff] }
0x24d9   :  { %3562 = vpow2.f32 %v2898_v6 }
0x24e1   :  { %v3561_v45 = vpop.eup %3560 }
0x24e2   :  { %2132 = vrot.lane.b32.xlu0 %v3561_v45, %s3892_s18 }
0x24e3   :  { %v3563_v7 = vpop.eup %3562 }
0x24e4   :  { %v2120_v8 = vadd.f32 1.0, %v3563_v7 }
0x24e6   :  { %3564 = vrcp.f32 %v2120_v8 }
0x24f0   :  { %v3565_v9 = vpop.eup %3564 }
0x24f1   :  { %v2130_v13 = vmul.f32 %v3565_v9, %v2128_v12 }
0x2554   :  { %v2133_v10 = vpop.permute.xlu0 %2132 }
0x2555   :  { %v2135_v11 = vmul.f32 %v3565_v9, %v2133_v10 }
0x2557   :  { %2137 = vrot.lane.b32.xlu1 %v2135_v11, %s3891_s15 }
0x25c9   :  { %v2138_v14 = vpop.permute.xlu1 %2137 }
0x25ca   :  { %v2140_v15 = vadd.f32 %v2138_v14, %v2130_v13 }
0x25cc   :  { %3566 = vtanh.f32 %v2140_v15  ;;  %v2243_v48 = vrot.slane %v2140_v15, 7 }
0x25cd   :  { %3568 = vpow2.f32 %v2899_v18 }
0x25d6   :  { %v3567_v16 = vpop.eup %3566 }
0x25d7   :  { %2143 = vrot.lane.b32.xlu0 %v3567_v16, %s3892_s18  ;;  %v3569_v19 = vpop.eup %3568 }
0x25d8   :  { %v2121_v20 = vadd.f32 1.0, %v3569_v19 }
0x25da   :  { %3570 = vrcp.f32 %v2121_v20 }
0x25e4   :  { %v3571_v49 = vpop.eup %3570 }
0x2649   :  { %v2144_v22 = vpop.permute.xlu0 %2143 }
0x264a   :  { %v2146_v24 = vmul.f32 %v3571_v49, %v2144_v22 }
0x264c   :  { %2147 = vst.msk [vmem:[#allocation2 + $0x8] sm:$0x8] %vm1224_vm7, %v2146_v24  ;;  %v2149_v25 = vrot.slane %v2146_v24, 3 }
0x264e   :  { %3200 = vmatmul.mubr.msk.f32.vlgmr.msra.gmra.mrb[18].mxu1 %vm162_vm0, %v2149_v25 }
0x264f   :  { %3374 = vmatpush3.bf16.msra.mxu1 %v4155_v23  ;;  %3221 = vmatprep.mubr.msk.f32.mxu1 %vm3890_vm3, %v3887_v0 }
0x2650   :  { %3375 = vmatprep.subr.bf16.mxu1 %v3889_v21 }
0x2653   :  { %3377 = vmatpush3.bf16.msra.mxu1 %v4165_v26 }
0x2721   :  { %v2218_v27 = vpop.f32.mrb[18].mxu1 }
0x2722   :  { %v2223_v29 = vrot.slane %v2218_v27, 4  ;;  %v3201_v30 = vpop.f32.mrb[19].mxu1 }
0x2724   :  { %2224 = vrot.lane.b32.xlu1 %v2223_v29, %s3891_s15 }
0x2796   :  { %v2225_v32 = vpop.permute.xlu1 %2224 }
0x2797   :  { %v2227_v33 = vadd.f32 %v2225_v32, %v4342_v46  ;;  %v2228_v54 = vadd.f32 %v2225_v32, %v4350_v60 }
0x2799   :  { %3572 = vtanh.f32 %v2227_v33  ;;  %v2901_v42 = vmul.f32 -1.442695, %v2227_v33  ;;  %v2902_v55 = vmul.f32 -1.442695, %v2228_v54 }
0x279b   :  { %3574 = vpow2.f32 %v2901_v42 }
0x27a3   :  { %v3573_v38 = vpop.eup %3572 }
0x27a4   :  { %2247 = vrot.lane.b32.xlu0 %v3573_v38, %s3892_s18 }
0x27a5   :  { %v3575_v62 = vpop.eup %3574 }
0x27a6   :  { %v2235_v39 = vadd.f32 1.0, %v3575_v62 }
0x27a8   :  { %3576 = vrcp.f32 %v2235_v39 }
0x27b2   :  { %v3577_v40 = vpop.eup %3576 }
0x27b3   :  { %v2245_v50 = vmul.f32 %v3577_v40, %v2243_v48 }
0x2816   :  { %v2248_v44 = vpop.permute.xlu0 %2247 }
0x2817   :  { %v2250_v47 = vmul.f32 %v3577_v40, %v2248_v44 }
0x2819   :  { %2252 = vrot.lane.b32.xlu1 %v2250_v47, %s3891_s15 }
0x288b   :  { %v2253_v51 = vpop.permute.xlu1 %2252 }
0x288c   :  { %v2255_v52 = vadd.f32 %v2253_v51, %v2245_v50 }
0x288e   :  { %3578 = vtanh.f32 %v2255_v52  ;;  %v2358_v37 = vrot.slane %v2255_v52, 7 }
0x288f   :  { %3580 = vpow2.f32 %v2902_v55 }
0x2898   :  { %v3579_v53 = vpop.eup %3578 }
0x2899   :  { %2258 = vrot.lane.b32.xlu0 %v3579_v53, %s3892_s18  ;;  %v3581_v56 = vpop.eup %3580 }
0x289a   :  { %v2236_v35 = vadd.f32 1.0, %v3581_v56 }
0x289c   :  { %3582 = vrcp.f32 %v2236_v35 }
0x28a6   :  { %v3583_v57 = vpop.eup %3582 }
0x290b   :  { %v2259_v28 = vpop.permute.xlu0 %2258 }
0x290c   :  { %v2261_v31 = vmul.f32 %v3583_v57, %v2259_v28 }
0x290e   :  { %2262 = vst.msk [vmem:[#allocation2 + $0x8] sm:$0x10] %vm1340_vm8, %v2261_v31  ;;  %v2264_v58 = vrot.slane %v2261_v31, 4 }
0x2910   :  { %3211 = vmatmul.mubr.msk.f32.vlgmr.msra.gmra.mrb[22].mxu0 %vm162_vm0, %v2264_v58 }
0x2911   :  { %3380 = vmatpush3.bf16.msra.mxu0 %v4155_v23  ;;  %3232 = vmatprep.mubr.msk.f32.mxu0 %vm3890_vm3, %v3887_v0 }
0x2912   :  { %3381 = vmatprep.subr.bf16.mxu0 %v3889_v21 }
0x2915   :  { %3383 = vmatpush3.bf16.msra.mxu0 %v4165_v26 }
0x29e3   :  { %v2333_v59 = vpop.f32.mrb[22].mxu0 }
0x29e4   :  { %v2338_v61 = vrot.slane %v2333_v59, 3  ;;  %v3212_v63 = vpop.f32.mrb[23].mxu0 }
0x29e6   :  { %2339 = vrot.lane.b32.xlu1 %v2338_v61, %s3891_s15 }
0x2a58   :  { %v2340_v1 = vpop.permute.xlu1 %2339 }
0x2a59   :  { %v2342_v2 = vadd.f32 %v2340_v1, %v4342_v46  ;;  %v2343_v9 = vadd.f32 %v2340_v1, %v4350_v60 }
0x2a5b   :  { %3584 = vtanh.f32 %v2342_v2  ;;  %v2904_v23 = vmul.f32 -1.442695, %v2342_v2  ;;  %v2905_v10 = vmul.f32 -1.442695, %v2343_v9 }
0x2a5d   :  { %3586 = vpow2.f32 %v2904_v23 }
0x2a65   :  { %v3585_v3 = vpop.eup %3584 }
0x2a66   :  { %2362 = vrot.lane.b32.xlu0 %v3585_v3, %s3892_s18 }
0x2a67   :  { %v3587_v4 = vpop.eup %3586 }
0x2a68   :  { %v2350_v0 = vadd.f32 1.0, %v3587_v4 }
0x2a6a   :  { %3588 = vrcp.f32 %v2350_v0 }
0x2a74   :  { %v3589_v21 = vpop.eup %3588 }
0x2a75   :  { %v2360_v45 = vmul.f32 %v3589_v21, %v2358_v37  ;;  %v2619_v37 = vld [vmem:[#allocation14 + $0x18] sm:$0xff] }
0x2ad8   :  { %v2363_v5 = vpop.permute.xlu0 %2362 }
0x2ad9   :  { %v2365_v26 = vmul.f32 %v3589_v21, %v2363_v5  ;;  %v2617_v21 = vld [vmem:[#allocation14 + $0x8] sm:$0xff] }
0x2adb   :  { %2367 = vrot.lane.b32.xlu1 %v2365_v26, %s3891_s15  ;;  %v2618_v26 = vld [vmem:[#allocation14 + $0x10] sm:$0xff] }
0x2b4d   :  { %v2368_v6 = vpop.permute.xlu1 %2367 }
0x2b4e   :  { %v2370_v7 = vadd.f32 %v2368_v6, %v2360_v45  ;;  %v3388_v45 = vpack.c.bf16 %v2619_v37, %v2618_v26 }
0x2b50   :  { %3590 = vtanh.f32 %v2370_v7  ;;  %v2473_v38 = vrot.slane %v2370_v7, 7 }
0x2b51   :  { %3592 = vpow2.f32 %v2905_v10 }
0x2b5a   :  { %v3591_v8 = vpop.eup %3590 }
0x2b5b   :  { %2373 = vrot.lane.b32.xlu0 %v3591_v8, %s3892_s18  ;;  %v3593_v11 = vpop.eup %3592 }
0x2b5c   :  { %v2351_v12 = vadd.f32 1.0, %v3593_v11 }
0x2b5e   :  { %3594 = vrcp.f32 %v2351_v12 }
0x2b68   :  { %v3595_v13 = vpop.eup %3594 }
0x2bcd   :  { %v2374_v14 = vpop.permute.xlu0 %2373 }
0x2bce   :  { %v2376_v15 = vmul.f32 %v3595_v13, %v2374_v14 }
0x2bd0   :  { %2377 = vst.msk [vmem:[#allocation2 + $0x8] sm:$0x20] %vm1456_vm9, %v2376_v15  ;;  %v2379_v16 = vrot.slane %v2376_v15, 5  ;;  %v2912_v15 = vld [vmem:[%s4531_s14] ss:$0 sm:$0xff]  ;;  %s3894_s14 = smov [#allocation16]  }
0x2bd1   :  { %s2816_s28 = sshll.u32 %s3894_s14, 4  ;;  %s2817_s28 = int_to_ptr.vmem [resolvable:$true] %s2816_s28 }
0x2bd2   :  { %3222 = vmatmul.mubr.msk.f32.vlgmr.msra.gmra.mrb[20].mxu1 %vm162_vm0, %v2379_v16  ;;  %s3798_s8 = scalar_lea.vmem %s2817_s28, 16  ;;  %s3802_s19 = scalar_lea.vmem %s2817_s28, 32 }
0x2bd3   :  { %3243 = vmatprep.mubr.msk.f32.mxu1 %vm162_vm0, %v2614_v17  ;;  %p3799_p0 = scmp.ne.s32.totalorder %s2817_s28, %s3798_s8  ;;  %p3803_p1 = scmp.lt.s32.totalorder %s2817_s28, %s2817_s28 }
0x2bd4   :  { %p3804_p2 = scmp.lt.s32.totalorder %s3802_s19, %s3798_s8 }
0x2bd6   :  { %p3805_p3 = por %p3804_p2, %p3803_p1 }
0x2bd8   :  { %p3806_p4 = pnand %p3805_p3, %p3799_p0 }
0x2ca5   :  { %v2448_v18 = vpop.f32.mrb[20].mxu1 }
0x2ca6   :  { %v2453_v19 = vrot.slane %v2448_v18, 2  ;;  %v3223_v20 = vpop.f32.mrb[21].mxu1 }
0x2ca8   :  { %2454 = vrot.lane.b32.xlu1 %v2453_v19, %s3891_s15 }
0x2d1a   :  { %v2455_v49 = vpop.permute.xlu1 %2454 }
0x2d1b   :  { %v2457_v22 = vadd.f32 %v2455_v49, %v4342_v46  ;;  %v2458_v44 = vadd.f32 %v2455_v49, %v4350_v60 }
0x2d1d   :  { %3596 = vtanh.f32 %v2457_v22  ;;  %v2907_v25 = vmul.f32 -1.442695, %v2457_v22  ;;  %v2908_v47 = vmul.f32 -1.442695, %v2458_v44 }
0x2d1f   :  { %3598 = vpow2.f32 %v2907_v25  ;;  %v2749_v25 = vsel %vm162_vm0, %v4195_v36, -inf }
0x2d27   :  { %v3597_v24 = vpop.eup %3596 }
0x2d28   :  { %2477 = vrot.lane.b32.xlu0 %v3597_v24, %s3892_s18  ;;  %v2746_v24 = vsel %vm162_vm0, %v4189_v34, -inf }
0x2d29   :  { %v3599_v27 = vpop.eup %3598 }
0x2d2a   :  { %v2465_v29 = vadd.f32 1.0, %v3599_v27  ;;  %v3893_v27 = vmov 32  }
0x2d2b   :  { %3418 = vset.pattern.permute.xlu1 %v3893_v27  ;;  %3419 = vset.pattern.permute.xlu0 %v3893_v27 }
0x2d2c   :  { %3600 = vrcp.f32 %v2465_v29 }
0x2d36   :  { %v3601_v30 = vpop.eup %3600 }
0x2d37   :  { %v2475_v42 = vmul.f32 %v3601_v30, %v2473_v38 }
0x2d9a   :  { %v2478_v32 = vpop.permute.xlu0 %2477 }
0x2d9b   :  { %v2480_v33 = vmul.f32 %v3601_v30, %v2478_v32 }
0x2d9d   :  { %2482 = vrot.lane.b32.xlu1 %v2480_v33, %s3891_s15 }
0x2e0f   :  { %v2483_v62 = vpop.permute.xlu1 %2482 }
0x2e10   :  { %v2485_v39 = vadd.f32 %v2483_v62, %v2475_v42 }
0x2e12   :  { %3602 = vtanh.f32 %v2485_v39  ;;  %v2588_v3 = vrot.slane %v2485_v39, 7 }
0x2e13   :  { %3604 = vpow2.f32 %v2908_v47 }
0x2e1c   :  { %v3603_v40 = vpop.eup %3602 }
0x2e1d   :  { %2488 = vrot.lane.b32.xlu0 %v3603_v40, %s3892_s18  ;;  %v3605_v48 = vpop.eup %3604 }
0x2e1e   :  { %v2466_v50 = vadd.f32 1.0, %v3605_v48 }
0x2e20   :  { %3606 = vrcp.f32 %v2466_v50 }
0x2e2a   :  { %v3607_v51 = vpop.eup %3606 }
0x2e8f   :  { %v2489_v52 = vpop.permute.xlu0 %2488 }
0x2e90   :  { %v2491_v53 = vmul.f32 %v3607_v51, %v2489_v52 }
0x2e92   :  { %2492 = vst.msk [vmem:[#allocation2 + $0x8] sm:$0x40] %vm1572_vm10, %v2491_v53  ;;  %v2494_v54 = vrot.slane %v2491_v53, 6 }
0x2e94   :  { %3233 = vmatmul.mubr.msk.f32.vlgmr.msra.gmra.mrb[24].mxu0 %vm162_vm0, %v2494_v54 }
0x2f67   :  { %v2563_v55 = vpop.f32.mrb[24].mxu0 }
0x2f68   :  { %v2568_v56 = vrot.slane %v2563_v55, 1  ;;  %v3234_v35 = vpop.f32.mrb[25].mxu0 }
0x2f6a   :  { %2569 = vrot.lane.b32.xlu1 %v2568_v56, %s3891_s15 }
0x2fdc   :  { %v2570_v57 = vpop.permute.xlu1 %2569 }
0x2fdd   :  { %v2572_v28 = vadd.f32 %v2570_v57, %v4342_v46  ;;  %v2616_v46 = vld [vmem:[#allocation14] sm:$0xff]  ;;  %v2573_v7 = vadd.f32 %v2570_v57, %v4350_v60 }
0x2fde   :  { %v3384_v5 = vpack.c.bf16 %v2617_v21, %v2616_v46 }
0x2fdf   :  { %3608 = vtanh.f32 %v2572_v28  ;;  %v2910_v58 = vmul.f32 -1.442695, %v2572_v28  ;;  %v2911_v8 = vmul.f32 -1.442695, %v2573_v7 }
0x2fe0   :  { %3385 = vmatprep.subr.bf16.mxu1 %v3384_v5 }
0x2fe1   :  { %3610 = vpow2.f32 %v2910_v58  ;;  %3387 = vmatpush3.bf16.msra.mxu1 %v3384_v5 }
0x2fe2   :  { %3389 = vmatprep.subr.bf16.mxu1 %v3388_v45 }
0x2fe5   :  { %3391 = vmatpush3.bf16.msra.mxu1 %v3388_v45 }
0x2fe9   :  { %v3609_v31 = vpop.eup %3608 }
0x2fea   :  { %2592 = vrot.lane.b32.xlu0 %v3609_v31, %s3892_s18 }
0x2feb   :  { %v3611_v59 = vpop.eup %3610 }
0x2fec   :  { %v2580_v61 = vadd.f32 1.0, %v3611_v59 }
0x2fee   :  { %3612 = vrcp.f32 %v2580_v61 }
0x2ff8   :  { %v3613_v63 = vpop.eup %3612 }
0x2ff9   :  { %v2590_v23 = vmul.f32 %v3613_v63, %v2588_v3 }
0x305c   :  { %v2593_v1 = vpop.permute.xlu0 %2592 }
0x305d   :  { %v2595_v2 = vmul.f32 %v3613_v63, %v2593_v1 }
0x305f   :  { %2597 = vrot.lane.b32.xlu1 %v2595_v2, %s3891_s15 }
0x30d1   :  { %v2598_v4 = vpop.permute.xlu1 %2597 }
0x30d2   :  { %v4436_v0 = vadd.f32 %v2598_v4, %v2590_v23 }
0x30d4   :  { %3614 = vtanh.f32 %v4436_v0 }
0x30d5   :  { %3616 = vpow2.f32 %v2911_v8 }
0x30de   :  { %v3615_v6 = vpop.eup %3614 }
0x30df   :  { %2603 = vrot.lane.b32.xlu0 %v3615_v6, %s3892_s18  ;;  %v3617_v9 = vpop.eup %3616 }
0x30e0   :  { %v2581_v10 = vadd.f32 1.0, %v3617_v9 }
0x30e2   :  { %3618 = vrcp.f32 %v2581_v10 }
0x30ec   :  { %v3619_v11 = vpop.eup %3618 }
0x3151   :  { %v2604_v12 = vpop.permute.xlu0 %2603 }
0x3152   :  { %v2606_v13 = vmul.f32 %v3619_v11, %v2604_v12 }
0x3154   :  { %2607 = vst.msk [vmem:[#allocation2 + $0x8] sm:$0x80] %vm1688_vm11, %v2606_v13  ;;  %2608 = vst.msk [vmem:[#allocation16 - $0x7] sm:$0x80] %vm1688_vm11, %v2606_v13 }
0x315b   :  { %v2615_v14 = vld [vmem:[#allocation2 + $0x8] sm:$0xff] }
0x315c   :  { %3244 = vmatmul.mubr.msk.f32.vlgmr.msra.gmra.mrb[22].mxu1 %vm162_vm0, %v2615_v14 }
0x322f   :  { %v3245_v60 = vpop.f32.mrb[22].mxu1 }
0x3230   :  { %v2705_v16 = vadd.f32 %v3245_v60, %v2912_v15  ;;  %v2699_v17 = vpop.f32.mrb[23].mxu1 }
0x3231   :  { %v2700_v18 = vadd.f32 %v2912_v15, %v2699_v17 }
0x3232   :  { %v2709_v19 = vadd.f32 %v2705_v16, %v4210_v43 }
0x3233   :  { %v2708_v20 = vadd.f32 %v2700_v18, %v4205_v41 }
0x3234   :  { %v2725_v49 = vsel %vm162_vm0, %v2709_v19, -inf  ;;  %v2916_v62 = vmul.f32 -1.442695, %v2709_v19 }
0x3235   :  { %2726 = vmax.xlane.f32.xlu0 %v2725_v49  ;;  %v2722_v22 = vsel %vm162_vm0, %v2708_v20, -inf  ;;  %v2915_v30 = vmul.f32 -1.442695, %v2708_v20 }
0x3236   :  { %2723 = vmax.xlane.f32.xlu1 %v2722_v22 }
0x3239   :  { %2747 = vmax.xlane.f32.xlu0 %v2746_v24 }
0x323d   :  { %2750 = vmax.xlane.f32.xlu0 %v2749_v25 }
0x32c2   :  { %v2727_v43 = vpop.xlane.xlu0 %2726 }
0x32c3   :  { %v4456_v32 = vsub.f32 %v2709_v19, %v2727_v43  ;;  %v2724_v28 = vpop.xlane.xlu1 %2723 }
0x32c4   :  { %v4466_v31 = vsub.f32 %v2708_v20, %v2724_v28 }
0x32c5   :  { %v2732_v39 = vmul.f32 1.442695, %v4456_v32 }
0x32c6   :  { %v2748_v29 = vpop.xlane.xlu0 %2747  ;;  %v2730_v58 = vmul.f32 1.442695, %v4466_v31 }
0x32c7   :  { %v2752_v41 = vsub.f32 %v4189_v34, %v2748_v29 }
0x32c9   :  { %v2754_v33 = vmul.f32 1.442695, %v2752_v41 }
0x32ca   :  { %v2751_v38 = vpop.xlane.xlu0 %2750 }
0x32cb   :  { %3620 = vpow2.f32 %v2754_v33  ;;  %v2753_v42 = vsub.f32 %v4195_v36, %v2751_v38 }
0x32cc   :  { %3622 = vpow2.f32 %v2915_v30 }
0x32cd   :  { %v2756_v40 = vmul.f32 1.442695, %v2753_v42 }
0x32cf   :  { %3624 = vpow2.f32 %v2756_v40 }
0x32d0   :  { %3626 = vpow2.f32 %v2916_v62 }
0x32d1   :  { %3628 = vpow2.f32 %v2732_v39 }
0x32d5   :  { %v4460_v44 = vpop.eup %3620 }
0x32d6   :  { %v3623_v47 = vpop.eup %3622  ;;  %v2758_v34 = vsel %vm162_vm0, %v4460_v44, 0.0 }
0x32d7   :  { %2759 = vadd.xlane.f32.xlu1 %v2758_v34  ;;  %v2716_v50 = vadd.f32 1.0, %v3623_v47 }
0x32d9   :  { %v3625_v48 = vpop.eup %3624  ;;  %3630 = vrcp.f32 %v2716_v50 }
0x32da   :  { %v3627_v51 = vpop.eup %3626  ;;  %v2761_v36 = vsel %vm162_vm0, %v3625_v48, 0.0 }
0x32db   :  { %v3629_v52 = vpop.eup %3628  ;;  %2762 = vadd.xlane.f32.xlu0 %v2761_v36  ;;  %v2717_v53 = vadd.f32 1.0, %v3627_v51 }
0x32dc   :  { %v2737_v54 = vsel %vm162_vm0, %v3629_v52, 0.0 }
0x32dd   :  { %3632 = vrcp.f32 %v2717_v53 }
0x32de   :  { %3634 = vpow2.f32 %v2730_v58 }
0x32df   :  { %2738 = vadd.xlane.f32.xlu0 %v2737_v54 }
0x32e3   :  { %v3631_v55 = vpop.eup %3630 }
0x32e4   :  { %v2780_v56 = vsub.f32 1.0, %v3631_v55 }
0x32e7   :  { %v3633_v35 = vpop.eup %3632 }
0x32e8   :  { %2770 = vperm.xlu1 %3418, %v3631_v55   ;;  %v2781_v57 = vsub.f32 1.0, %v3633_v35  ;;  %v3635_v59 = vpop.eup %3634 }
0x32e9   :  { %v2734_v61 = vsel %vm162_vm0, %v3635_v59, 0.0 }
0x32ec   :  { %2784 = vperm.xlu1 %3418, %v2780_v56  }
0x32f0   :  { %2789 = vperm.xlu1 %3418, %v2781_v57  }
0x32f5   :  { %2775 = vperm.xlu0 %3419, %v3633_v35  }
0x3314   :  { %2735 = vadd.xlane.f32.xlu1 %v2734_v61 }
0x3325   :  { %2610 = vrot.lane.b32.xlu1 %v4436_v0, %s3892_s18 }
0x3326   :  { %3809 = shalt.err (!%p3806_p4)
}
0x3327   :  { %s3810_s10 = scalar_lea.hbm %s4533_s16, 16 }
0x3328   :  { %p3811_p5 = scmp.ne.s32.totalorder %s4533_s16, %s3810_s10  ;;  %p3814_p6 = scmp.lt.u32.totalorder %s3810_s10, %s4533_s16 }
0x332a   :  { %p3816_p7 = pnand %p3814_p6, %p3811_p5 }
0x332c   :  { %3819 = shalt.err (!%p3816_p7)
}
0x332d   :  { %2819 = dma.vmem_to_hbm [thread:$0]  %s2817_s28, 16, %s4533_s16, [#allocation17]  }
0x332e   :  { %s3895_s16 = smov [#allocation18]  }
0x332f   :  { %s2826_s29 = sshll.u32 %s3895_s16, 4  ;;  %s2827_s29 = int_to_ptr.vmem [resolvable:$true] %s2826_s29 }
0x3330   :  { %s3820_s30 = scalar_lea.vmem %s2827_s29, 16  ;;  %s3824_s7 = scalar_lea.vmem %s2827_s29, 32 }
0x3331   :  { %p3821_p8 = scmp.ne.s32.totalorder %s2827_s29, %s3820_s30  ;;  %p3825_p9 = scmp.lt.s32.totalorder %s2827_s29, %s2827_s29 }
0x3332   :  { %p3826_p10 = scmp.lt.s32.totalorder %s3824_s7, %s3820_s30 }
0x3334   :  { %p3827_p11 = por %p3826_p10, %p3825_p9 }
0x3336   :  { %p3828_p12 = pnand %p3827_p11, %p3821_p8 }
0x3364   :  { %v2760_v1 = vpop.xlane.xlu1 %2759 }
0x3368   :  { %v2763_v63 = vpop.xlane.xlu0 %2762  ;;  %v2771_v3 = vpop.permute.xlu1 %2770 }
0x3369   :  { %3636 = vrcp.f32 %v2763_v63 }
0x336c   :  { %v2739_v2 = vpop.xlane.xlu0 %2738  ;;  %v2785_v4 = vpop.permute.xlu1 %2784 }
0x336d   :  { %3638 = vlog2.f32 %v2739_v2 }
0x336e   :  { %3640 = vrcp.f32 %v2760_v1 }
0x3370   :  { %v2790_v37 = vpop.permute.xlu1 %2789 }
0x3373   :  { %v3637_v23 = vpop.eup %3636 }
0x3374   :  { %v2767_v21 = vmul.f32 %v3637_v23, %v3625_v48  ;;  %v2776_v5 = vpop.permute.xlu0 %2775 }
0x3376   :  { %v2779_v6 = vmul.f32 %v2776_v5, %v2767_v21 }
0x3377   :  { %v3639_v0 = vpop.eup %3638 }
0x3378   :  { %v2743_v46 = vmul.f32 0.6931472, %v3639_v0 }
0x337a   :  { %v2745_v26 = vsub.f32 %v4456_v32, %v2743_v46 }
0x337c   :  { %v2793_v45 = vmul.f32 %v2790_v37, %v2745_v26 }
0x337e   :  { %v2795_v7 = vadd.f32 %v2793_v45, %v2779_v6 }
0x3380   :  { %2797 = vst.msk [vmem:[#allocation15 + $0x8] sm:$0xff] %vm162_vm0, %v2795_v7 }
0x33a1   :  { %v2736_v8 = vpop.xlane.xlu1 %2735 }
0x33a2   :  { %3642 = vlog2.f32 %v2736_v8 }
0x33a5   :  { %v2611_v9 = vpop.permute.xlu1 %2610 }
0x33a6   :  { %2613 = vst.msk [vmem:[#allocation18 - $0x7] sm:$0x80] %vm1688_vm11, %v2611_v9 }
0x33a7   :  { %3831 = shalt.err (!%p3828_p12)
}
0x33a8   :  { %s3832_s0 = scalar_lea.hbm %s4534_s17, 16 }
0x33a9   :  { %p3833_p13 = scmp.ne.s32.totalorder %s4534_s17, %s3832_s0  ;;  %p3836_p0 = scmp.lt.u32.totalorder %s3832_s0, %s4534_s17 }
0x33ab   :  { %p3838_p1 = pnand %p3836_p0, %p3833_p13 }
0x33ad   :  { %3841 = shalt.err (!%p3838_p1)
}
0x33ae   :  { %2829 = dma.vmem_to_hbm [thread:$0]  %s2827_s29, 16, %s4534_s17, [#allocation17]   ;;  %v3641_v10 = vpop.eup %3640 }
0x33af   :  { %v3643_v11 = vpop.eup %3642  ;;  %v2766_v12 = vmul.f32 %v3641_v10, %v4460_v44  ;;  %s3896_s3 = smov [#allocation15]  }
0x33b0   :  { %v2741_v13 = vmul.f32 0.6931472, %v3643_v11  ;;  %s2803_s6 = sshll.u32 %s3896_s3, 4  ;;  %s2804_s6 = int_to_ptr.vmem [resolvable:$true] %s2803_s6 }
0x33b1   :  { %v2778_v15 = vmul.f32 %v2771_v3, %v2766_v12  ;;  %s3842_s14 = scalar_lea.vmem %s2804_s6, 256  ;;  %p3847_p3 = scmp.lt.s32.totalorder %s2804_s6, %s2804_s6 }
0x33b2   :  { %v2744_v14 = vsub.f32 %v4466_v31, %v2741_v13  ;;  %p3843_p2 = scmp.ne.s32.totalorder %s2804_s6, %s3842_s14  ;;  %p3848_p4 = scmp.lt.s32.totalorder %s3842_s14, %s3842_s14 }
0x33b4   :  { %v2792_v60 = vmul.f32 %v2785_v4, %v2744_v14  ;;  %p3849_p5 = por %p3848_p4, %p3847_p3 }
0x33b6   :  { %v2794_v16 = vadd.f32 %v2792_v60, %v2778_v15  ;;  %p3850_p6 = pnand %p3849_p5, %p3843_p2 }
0x33b8   :  { %2796 = vst.msk [vmem:[#allocation15] sm:$0xff] %vm162_vm0, %v2794_v16 }
0x33b9   :  { %3853 = shalt.err (!%p3850_p6)
}
0x33ba   :  { %s4545_s8 = sld [smem:[#allocation27_spill]] }
0x33c0   :  { %s3854_s19 = scalar_lea.hbm %s4545_s8, 256 }
0x33c1   :  { %p3855_p7 = scmp.ne.s32.totalorder %s4545_s8, %s3854_s19  ;;  %p3858_p8 = scmp.lt.u32.totalorder %s3854_s19, %s4545_s8 }
0x33c3   :  { %p3860_p9 = pnand %p3858_p8, %p3855_p7 }
0x33c5   :  { %3863 = shalt.err (!%p3860_p9)
}
0x33c6   :  { %2809 = dma.vmem_to_hbm [thread:$0]  %s2804_s6, 256, %s4545_s8, [#allocation5], %s3878_s22, %s3878_s22, %s3879_s23  }
0x33c7   :  { %3872 = dma.done.wait [#allocation5], 256  }
0x33c8   :  { %3873 = vsyncadd [#allocation5], 4294967040 }
0x33c9   :  { %3874 = dma.done.wait [#allocation17], 32  }
0x33ca   :  { %3875 = vsyncadd [#allocation17], 4294967264 }
0x33cb   :  { %2839 = vsyncpa [#allocation4], 1 }
0x33cc   :  { %2840 = vsyncpa [#allocation7], 1 }
0x33cd   :  { %2841 = vsyncpa [#allocation10], 1 }
0x33ce   :  { %2842 = vsyncpa [#allocation13], 1 }
0x33cf   :  { %2843 = vsyncpa [#allocation5], 1 }
0x33d0   :  { %2844 = vsyncpa [#allocation17], 1 }

</bundles_post_ra>
